<compile_context>
chip_gen: v6e
topology: v6e:2x2x1
jax: 0.10.0
libtpu: 0.0.40
codegen_flags: <defaults>
</compile_context>

<pallas_src>
import functools

import jax
import jax.numpy as jnp
from jax import lax
from jax.experimental import pallas as pl
from jax.experimental.pallas import tpu as pltpu


def _round_up(v, m):
    return (v + m - 1) // m * m


# ------------------------------ Pallas kernel ------------------------------ #
def _conv_bias_relu_kernel(x_ref, w_ref, b_ref, o_ref, *, k, Wp, L):
    """One (batch, Cout-tile) grid step of fused zero-pad conv + bias + ReLU.

    x_ref: (1, Sp, Cin)    f32   zero-padded image, spatial dims flattened
    w_ref: (k*k, Cin, Ct)  bf16  weights for this Cout tile, tap-major
    b_ref: (1, Ct)         f32   bias slice
    o_ref: (1, L, Ct)      f32   output in padded-width layout (L = OH1*Wp)

    The k*k taps are unrolled with *static* flat-window offsets; each tap is a
    (L, Cin) x (Cin, Ct) MXU matmul with bf16 operands and f32 accumulation,
    accumulated in-place into the VMEM-resident output block.  Columns
    [OW1, Wp) of each output row are wrap-around junk discarded by the caller.
    """
    for kh in range(k):
        for kw in range(k):
            j = kh * k + kw
            off = kh * Wp + kw                                   # static shift
            xs = x_ref[0, pl.ds(off, L), :].astype(jnp.bfloat16)  # (L, Cin)
            part = jnp.dot(xs, w_ref[j], preferred_element_type=jnp.float32)
            if j == 0:
                o_ref[0] = part + b_ref[...]        # fold bias into tap 0
            else:
                o_ref[0] += part
    o_ref[...] = jnp.maximum(o_ref[...], 0.0)       # ReLU


def _conv_bias_relu(x_flat, w_packed, b_row, *, k, Wp, L, ct):
    N, Sp, Cin = x_flat.shape
    kk, _, Coutp = w_packed.shape
    assert kk == k * k and Coutp % ct == 0
    n_ct = Coutp // ct

    # Double-buffered working set estimate (+ slack), clamped below v7x's 64MiB.
    est = 2 * (Sp * Cin * 4 + kk * Cin * ct * 2 + ct * 4 + L * ct * 4) + (1 << 20)
    vmem_limit = int(min(max(2 * est, 16 << 20), 48 << 20))

    kernel = functools.partial(_conv_bias_relu_kernel, k=k, Wp=Wp, L=L)
    return pl.pallas_call(
        kernel,
        out_shape=jax.ShapeDtypeStruct((N, L, Coutp), jnp.float32),
        grid_spec=pltpu.PrefetchScalarGridSpec(
            num_scalar_prefetch=0,
            grid=(N, n_ct),          # Cout tiles innermost: image stays resident
            in_specs=[
                pl.BlockSpec((1, Sp, Cin), lambda n, c: (n, 0, 0)),
                pl.BlockSpec((kk, Cin, ct), lambda n, c: (0, 0, c)),
                pl.BlockSpec((1, ct), lambda n, c: (0, c)),
            ],
            out_specs=pl.BlockSpec((1, L, ct), lambda n, c: (n, 0, c)),
        ),
        compiler_params=pltpu.CompilerParams(
            dimension_semantics=("parallel", "parallel"),
            vmem_limit_bytes=vmem_limit,
        ),
    )(x_flat, w_packed, b_row)


# ------------------------------- Conv2dBlock ------------------------------- #
class Conv2dBlockPallas:
    """Conv2dBlock(input_dim, output_dim, kernel_size, stride, padding,
    dilation=1, norm='none', activation='relu', pad_type='zero', bias=True)."""

    def __init__(self, input_dim, output_dim, kernel_size,
                 stride=1, padding=0, key=None):
        self.cin = input_dim
        self.cout = output_dim
        self.k = kernel_size
        self.stride = stride
        self.padding = padding
        if key is None:
            key = jax.random.PRNGKey(0)
        kw_key, kb_key = jax.random.split(key)
        fan_in = input_dim * kernel_size * kernel_size
        bound = 1.0 / float(fan_in) ** 0.5
        # deterministic PyTorch-style uniform init (synthetic weights)
        self.weight = jax.random.uniform(
            kw_key, (output_dim, input_dim, kernel_size, kernel_size),
            minval=-bound, maxval=bound, dtype=jnp.float32)
        self.bias = jax.random.uniform(
            kb_key, (output_dim,), minval=-bound, maxval=bound,
            dtype=jnp.float32)

        # Pre-packed kernel operands: tap-major bf16 weight with Cout padded to
        # a multiple of 128 lanes; f32 bias row.
        self.cout_p = _round_up(output_dim, 128)
        # 256-wide Cout tiles feed the 256-wide MXUs (v6e/v7x); 128 otherwise.
        self.ct = 256 if self.cout_p % 256 == 0 else 128
        k = kernel_size
        w_t = jnp.transpose(self.weight, (2, 3, 1, 0)).reshape(
            k * k, input_dim, output_dim)                       # [kh*k+kw, ci, co]
        self.w_packed = jnp.pad(
            w_t, ((0, 0), (0, 0), (0, self.cout_p - output_dim))
        ).astype(jnp.bfloat16)
        self.b_row = jnp.pad(
            self.bias, (0, self.cout_p - output_dim)
        ).reshape(1, self.cout_p).astype(jnp.float32)
        # TODO(synk): norm='bn'/'in'/'ln'/'adain', non-ReLU activations,
        # reflection padding and spectral_norm are not exercised by the default
        # Conv2dBlock config and are not implemented here.

    def __call__(self, x):
        # x: (N, Cin, H, W) NCHW (PyTorch convention).  In a full network keep
        # activations in NHWC throughout and drop the two boundary transposes.
        N, C, H, W = x.shape
        assert C == self.cin
        p, k, s = self.padding, self.k, self.stride

        Hp, Wp = H + 2 * p, W + 2 * p
        assert Hp >= k and Wp >= k
        OH1, OW1 = Hp - k + 1, Wp - k + 1            # stride-1 output size
        L = OH1 * Wp                                 # padded-width output rows

        # NCHW -> NHWC, zero-pad.  One extra padded bottom row keeps every
        # tap's flat window [off, off + L) in bounds (off_max + L = Hp*Wp+k-1).
        extra = 0 if k == 1 else 1
        x_nhwc = jnp.transpose(x, (0, 2, 3, 1))
        x_pad = jnp.pad(x_nhwc, ((0, 0), (p, p + extra), (p, p), (0, 0)))
        x_flat = x_pad.reshape(N, (Hp + extra) * Wp, C).astype(jnp.float32)
        assert (k - 1) * Wp + (k - 1) + L <= x_flat.shape[1]

        out_flat = _conv_bias_relu(x_flat, self.w_packed, self.b_row,
                                   k=k, Wp=Wp, L=L, ct=self.ct)  # (N, L, Coutp)

        # Padded-width rows -> NHWC; drop wrap-around columns and Cout padding.
        out = out_flat.reshape(N, OH1, Wp, self.cout_p)[:, :, :OW1, :self.cout]
        if s > 1:
            # TODO(synk): stride>1 computes the stride-1 conv and subsamples
            # (s^2 overcompute); fold the stride into the kernel offsets if
            # strided Conv2dBlocks ever become hot.
            out = out[:, ::s, ::s, :]
        return jnp.transpose(out, (0, 3, 1, 2))      # back to NCHW


# ---------------------------------- main ----------------------------------- #
if __name__ == "__main__":
    key = jax.random.PRNGKey(0)
    kx, kp = jax.random.split(key)

    N, Cin, H, W = 2, 4, 16, 16
    Cout, K, stride, pad = 8, 3, 1, 1

    x = jax.random.normal(kx, (N, Cin, H, W), dtype=jnp.float32)
    block = Conv2dBlockPallas(Cin, Cout, K, stride=stride, padding=pad, key=kp)

    fwd = jax.jit(block.__call__)
    out = jax.block_until_ready(fwd(x))

    # Reference with matching operand precision (bf16 operands, f32 accumulate):
    # conv -> bias -> ReLU.
    ref = lax.conv_general_dilated(
        x.astype(jnp.bfloat16), block.weight.astype(jnp.bfloat16),
        window_strides=(stride, stride), padding=[(pad, pad), (pad, pad)],
        dimension_numbers=("NCHW", "OIHW", "NCHW"),
        preferred_element_type=jnp.float32)
    ref = jnp.maximum(ref + block.bias[None, :, None, None], 0.0)

    assert out.shape == (N, Cout, H, W), out.shape
    err = float(jnp.max(jnp.abs(out - ref)))
    assert jnp.allclose(out, ref, atol=1e-3, rtol=1e-3), err

    print("KERNEL_OK")
</pallas_src>

<mosaic_0001>
module attributes {stable_mosaic.version = 11 : i64} {
  func.func @_conv_bias_relu_kernel(%arg0: i32, %arg1: i32, %arg2: memref<1x342x4xf32, #tpu.memory_space<vmem>>, %arg3: memref<9x4x128xbf16, #tpu.memory_space<vmem>>, %arg4: memref<1x128xf32, #tpu.memory_space<vmem>>, %arg5: memref<1x288x128xf32, #tpu.memory_space<vmem>>) attributes {dimension_semantics = [#tpu.dimension_semantics<parallel>, #tpu.dimension_semantics<parallel>], iteration_bounds = array<i64: 2, 1>, scalar_prefetch = 0 : i64, scratch_operands = 0 : i64, tpu.core_type = #tpu.core_type<tc>, window_params = [{transform_indices = @transform_0, window_bounds = array<i64: 1, 342, 4>}, {transform_indices = @transform_1, window_bounds = array<i64: 9, 4, 128>}, {transform_indices = @transform_2, window_bounds = array<i64: 1, 128>}, {transform_indices = @transform_3, window_bounds = array<i64: 1, 288, 128>}]} {
    %c0 = arith.constant 0 : index
    %c0_0 = arith.constant 0 : index
    %c0_1 = arith.constant 0 : index
    %0 = vector.load %arg2[%c0, %c0_0, %c0_1] : memref<1x342x4xf32, #tpu.memory_space<vmem>>, vector<1x288x4xf32>
    %1 = vector.shape_cast %0 : vector<1x288x4xf32> to vector<288x4xf32>
    %2 = arith.truncf %1 : vector<288x4xf32> to vector<288x4xbf16>
    %c0_2 = arith.constant 0 : index
    %c0_3 = arith.constant 0 : index
    %c0_4 = arith.constant 0 : index
    %3 = vector.load %arg3[%c0_2, %c0_3, %c0_4] : memref<9x4x128xbf16, #tpu.memory_space<vmem>>, vector<1x4x128xbf16>
    %4 = vector.shape_cast %3 : vector<1x4x128xbf16> to vector<4x128xbf16>
    %cst = arith.constant dense<0.000000e+00> : vector<288x128xf32>
    %5 = tpu.matmul %2, %4, %cst {dimension_numbers = #tpu.dot_dimension_numbers<[1], [0], [0], [1], [0, 0, 1, 1], [], []>} : vector<288x4xbf16>, vector<4x128xbf16>, vector<288x128xf32> -> vector<288x128xf32>
    %c0_5 = arith.constant 0 : index
    %c0_6 = arith.constant 0 : index
    %6 = vector.load %arg4[%c0_5, %c0_6] : memref<1x128xf32, #tpu.memory_space<vmem>>, vector<1x128xf32>
    %7 = vector.broadcast %6 : vector<1x128xf32> to vector<288x128xf32>
    %8 = arith.addf %5, %7 : vector<288x128xf32>
    %c0_7 = arith.constant 0 : index
    %c0_8 = arith.constant 0 : index
    %c0_9 = arith.constant 0 : index
    %9 = vector.load %arg5[%c0_7, %c0_8, %c0_9] : memref<1x288x128xf32, #tpu.memory_space<vmem>>, vector<1x288x128xf32>
    %10 = vector.shape_cast %9 : vector<1x288x128xf32> to vector<288x128xf32>
    %11 = vector.shape_cast %8 : vector<288x128xf32> to vector<1x288x128xf32>
    tpu.vector_store %arg5[%c0_7, %c0_8, %c0_9], %11 {strides = array<i32>} : memref<1x288x128xf32, #tpu.memory_space<vmem>>, vector<1x288x128xf32>,
    %c0_10 = arith.constant 0 : index
    %c1 = arith.constant 1 : index
    %c0_11 = arith.constant 0 : index
    %12 = vector.load %arg2[%c0_10, %c1, %c0_11] : memref<1x342x4xf32, #tpu.memory_space<vmem>>, vector<1x288x4xf32>
    %13 = vector.shape_cast %12 : vector<1x288x4xf32> to vector<288x4xf32>
    %14 = arith.truncf %13 : vector<288x4xf32> to vector<288x4xbf16>
    %c1_12 = arith.constant 1 : index
    %c0_13 = arith.constant 0 : index
    %c0_14 = arith.constant 0 : index
    %15 = vector.load %arg3[%c1_12, %c0_13, %c0_14] : memref<9x4x128xbf16, #tpu.memory_space<vmem>>, vector<1x4x128xbf16>
    %16 = vector.shape_cast %15 : vector<1x4x128xbf16> to vector<4x128xbf16>
    %cst_15 = arith.constant dense<0.000000e+00> : vector<288x128xf32>
    %17 = tpu.matmul %14, %16, %cst_15 {dimension_numbers = #tpu.dot_dimension_numbers<[1], [0], [0], [1], [0, 0, 1, 1], [], []>} : vector<288x4xbf16>, vector<4x128xbf16>, vector<288x128xf32> -> vector<288x128xf32>
    %c0_16 = arith.constant 0 : index
    %c0_17 = arith.constant 0 : index
    %c0_18 = arith.constant 0 : index
    %18 = vector.load %arg5[%c0_16, %c0_17, %c0_18] : memref<1x288x128xf32, #tpu.memory_space<vmem>>, vector<1x288x128xf32>
    %19 = vector.shape_cast %18 : vector<1x288x128xf32> to vector<288x128xf32>
    %20 = arith.addf %19, %17 : vector<288x128xf32>
    %c0_19 = arith.constant 0 : index
    %c0_20 = arith.constant 0 : index
    %c0_21 = arith.constant 0 : index
    %21 = vector.load %arg5[%c0_19, %c0_20, %c0_21] : memref<1x288x128xf32, #tpu.memory_space<vmem>>, vector<1x288x128xf32>
    %22 = vector.shape_cast %21 : vector<1x288x128xf32> to vector<288x128xf32>
    %23 = vector.shape_cast %20 : vector<288x128xf32> to vector<1x288x128xf32>
    tpu.vector_store %arg5[%c0_19, %c0_20, %c0_21], %23 {strides = array<i32>} : memref<1x288x128xf32, #tpu.memory_space<vmem>>, vector<1x288x128xf32>,
    %c0_22 = arith.constant 0 : index
    %c2 = arith.constant 2 : index
    %c0_23 = arith.constant 0 : index
    %24 = vector.load %arg2[%c0_22, %c2, %c0_23] : memref<1x342x4xf32, #tpu.memory_space<vmem>>, vector<1x288x4xf32>
    %25 = vector.shape_cast %24 : vector<1x288x4xf32> to vector<288x4xf32>
    %26 = arith.truncf %25 : vector<288x4xf32> to vector<288x4xbf16>
    %c2_24 = arith.constant 2 : index
    %c0_25 = arith.constant 0 : index
    %c0_26 = arith.constant 0 : index
    %27 = vector.load %arg3[%c2_24, %c0_25, %c0_26] : memref<9x4x128xbf16, #tpu.memory_space<vmem>>, vector<1x4x128xbf16>
    %28 = vector.shape_cast %27 : vector<1x4x128xbf16> to vector<4x128xbf16>
    %cst_27 = arith.constant dense<0.000000e+00> : vector<288x128xf32>
    %29 = tpu.matmul %26, %28, %cst_27 {dimension_numbers = #tpu.dot_dimension_numbers<[1], [0], [0], [1], [0, 0, 1, 1], [], []>} : vector<288x4xbf16>, vector<4x128xbf16>, vector<288x128xf32> -> vector<288x128xf32>
    %c0_28 = arith.constant 0 : index
    %c0_29 = arith.constant 0 : index
    %c0_30 = arith.constant 0 : index
    %30 = vector.load %arg5[%c0_28, %c0_29, %c0_30] : memref<1x288x128xf32, #tpu.memory_space<vmem>>, vector<1x288x128xf32>
    %31 = vector.shape_cast %30 : vector<1x288x128xf32> to vector<288x128xf32>
    %32 = arith.addf %31, %29 : vector<288x128xf32>
    %c0_31 = arith.constant 0 : index
    %c0_32 = arith.constant 0 : index
    %c0_33 = arith.constant 0 : index
    %33 = vector.load %arg5[%c0_31, %c0_32, %c0_33] : memref<1x288x128xf32, #tpu.memory_space<vmem>>, vector<1x288x128xf32>
    %34 = vector.shape_cast %33 : vector<1x288x128xf32> to vector<288x128xf32>
    %35 = vector.shape_cast %32 : vector<288x128xf32> to vector<1x288x128xf32>
    tpu.vector_store %arg5[%c0_31, %c0_32, %c0_33], %35 {strides = array<i32>} : memref<1x288x128xf32, #tpu.memory_space<vmem>>, vector<1x288x128xf32>,
    %c0_34 = arith.constant 0 : index
    %c18 = arith.constant 18 : index
    %c0_35 = arith.constant 0 : index
    %36 = vector.load %arg2[%c0_34, %c18, %c0_35] : memref<1x342x4xf32, #tpu.memory_space<vmem>>, vector<1x288x4xf32>
    %37 = vector.shape_cast %36 : vector<1x288x4xf32> to vector<288x4xf32>
    %38 = arith.truncf %37 : vector<288x4xf32> to vector<288x4xbf16>
    %c3 = arith.constant 3 : index
    %c0_36 = arith.constant 0 : index
    %c0_37 = arith.constant 0 : index
    %39 = vector.load %arg3[%c3, %c0_36, %c0_37] : memref<9x4x128xbf16, #tpu.memory_space<vmem>>, vector<1x4x128xbf16>
    %40 = vector.shape_cast %39 : vector<1x4x128xbf16> to vector<4x128xbf16>
    %cst_38 = arith.constant dense<0.000000e+00> : vector<288x128xf32>
    %41 = tpu.matmul %38, %40, %cst_38 {dimension_numbers = #tpu.dot_dimension_numbers<[1], [0], [0], [1], [0, 0, 1, 1], [], []>} : vector<288x4xbf16>, vector<4x128xbf16>, vector<288x128xf32> -> vector<288x128xf32>
    %c0_39 = arith.constant 0 : index
    %c0_40 = arith.constant 0 : index
    %c0_41 = arith.constant 0 : index
    %42 = vector.load %arg5[%c0_39, %c0_40, %c0_41] : memref<1x288x128xf32, #tpu.memory_space<vmem>>, vector<1x288x128xf32>
    %43 = vector.shape_cast %42 : vector<1x288x128xf32> to vector<288x128xf32>
    %44 = arith.addf %43, %41 : vector<288x128xf32>
    %c0_42 = arith.constant 0 : index
    %c0_43 = arith.constant 0 : index
    %c0_44 = arith.constant 0 : index
    %45 = vector.load %arg5[%c0_42, %c0_43, %c0_44] : memref<1x288x128xf32, #tpu.memory_space<vmem>>, vector<1x288x128xf32>
    %46 = vector.shape_cast %45 : vector<1x288x128xf32> to vector<288x128xf32>
    %47 = vector.shape_cast %44 : vector<288x128xf32> to vector<1x288x128xf32>
    tpu.vector_store %arg5[%c0_42, %c0_43, %c0_44], %47 {strides = array<i32>} : memref<1x288x128xf32, #tpu.memory_space<vmem>>, vector<1x288x128xf32>,
    %c0_45 = arith.constant 0 : index
    %c19 = arith.constant 19 : index
    %c0_46 = arith.constant 0 : index
    %48 = vector.load %arg2[%c0_45, %c19, %c0_46] : memref<1x342x4xf32, #tpu.memory_space<vmem>>, vector<1x288x4xf32>
    %49 = vector.shape_cast %48 : vector<1x288x4xf32> to vector<288x4xf32>
    %50 = arith.truncf %49 : vector<288x4xf32> to vector<288x4xbf16>
    %c4 = arith.constant 4 : index
    %c0_47 = arith.constant 0 : index
    %c0_48 = arith.constant 0 : index
    %51 = vector.load %arg3[%c4, %c0_47, %c0_48] : memref<9x4x128xbf16, #tpu.memory_space<vmem>>, vector<1x4x128xbf16>
    %52 = vector.shape_cast %51 : vector<1x4x128xbf16> to vector<4x128xbf16>
    %cst_49 = arith.constant dense<0.000000e+00> : vector<288x128xf32>
    %53 = tpu.matmul %50, %52, %cst_49 {dimension_numbers = #tpu.dot_dimension_numbers<[1], [0], [0], [1], [0, 0, 1, 1], [], []>} : vector<288x4xbf16>, vector<4x128xbf16>, vector<288x128xf32> -> vector<288x128xf32>
    %c0_50 = arith.constant 0 : index
    %c0_51 = arith.constant 0 : index
    %c0_52 = arith.constant 0 : index
    %54 = vector.load %arg5[%c0_50, %c0_51, %c0_52] : memref<1x288x128xf32, #tpu.memory_space<vmem>>, vector<1x288x128xf32>
    %55 = vector.shape_cast %54 : vector<1x288x128xf32> to vector<288x128xf32>
    %56 = arith.addf %55, %53 : vector<288x128xf32>
    %c0_53 = arith.constant 0 : index
    %c0_54 = arith.constant 0 : index
    %c0_55 = arith.constant 0 : index
    %57 = vector.load %arg5[%c0_53, %c0_54, %c0_55] : memref<1x288x128xf32, #tpu.memory_space<vmem>>, vector<1x288x128xf32>
    %58 = vector.shape_cast %57 : vector<1x288x128xf32> to vector<288x128xf32>
    %59 = vector.shape_cast %56 : vector<288x128xf32> to vector<1x288x128xf32>
    tpu.vector_store %arg5[%c0_53, %c0_54, %c0_55], %59 {strides = array<i32>} : memref<1x288x128xf32, #tpu.memory_space<vmem>>, vector<1x288x128xf32>,
    %c0_56 = arith.constant 0 : index
    %c20 = arith.constant 20 : index
    %c0_57 = arith.constant 0 : index
    %60 = vector.load %arg2[%c0_56, %c20, %c0_57] : memref<1x342x4xf32, #tpu.memory_space<vmem>>, vector<1x288x4xf32>
    %61 = vector.shape_cast %60 : vector<1x288x4xf32> to vector<288x4xf32>
    %62 = arith.truncf %61 : vector<288x4xf32> to vector<288x4xbf16>
    %c5 = arith.constant 5 : index
    %c0_58 = arith.constant 0 : index
    %c0_59 = arith.constant 0 : index
    %63 = vector.load %arg3[%c5, %c0_58, %c0_59] : memref<9x4x128xbf16, #tpu.memory_space<vmem>>, vector<1x4x128xbf16>
    %64 = vector.shape_cast %63 : vector<1x4x128xbf16> to vector<4x128xbf16>
    %cst_60 = arith.constant dense<0.000000e+00> : vector<288x128xf32>
    %65 = tpu.matmul %62, %64, %cst_60 {dimension_numbers = #tpu.dot_dimension_numbers<[1], [0], [0], [1], [0, 0, 1, 1], [], []>} : vector<288x4xbf16>, vector<4x128xbf16>, vector<288x128xf32> -> vector<288x128xf32>
    %c0_61 = arith.constant 0 : index
    %c0_62 = arith.constant 0 : index
    %c0_63 = arith.constant 0 : index
    %66 = vector.load %arg5[%c0_61, %c0_62, %c0_63] : memref<1x288x128xf32, #tpu.memory_space<vmem>>, vector<1x288x128xf32>
    %67 = vector.shape_cast %66 : vector<1x288x128xf32> to vector<288x128xf32>
    %68 = arith.addf %67, %65 : vector<288x128xf32>
    %c0_64 = arith.constant 0 : index
    %c0_65 = arith.constant 0 : index
    %c0_66 = arith.constant 0 : index
    %69 = vector.load %arg5[%c0_64, %c0_65, %c0_66] : memref<1x288x128xf32, #tpu.memory_space<vmem>>, vector<1x288x128xf32>
    %70 = vector.shape_cast %69 : vector<1x288x128xf32> to vector<288x128xf32>
    %71 = vector.shape_cast %68 : vector<288x128xf32> to vector<1x288x128xf32>
    tpu.vector_store %arg5[%c0_64, %c0_65, %c0_66], %71 {strides = array<i32>} : memref<1x288x128xf32, #tpu.memory_space<vmem>>, vector<1x288x128xf32>,
    %c0_67 = arith.constant 0 : index
    %c36 = arith.constant 36 : index
    %c0_68 = arith.constant 0 : index
    %72 = vector.load %arg2[%c0_67, %c36, %c0_68] : memref<1x342x4xf32, #tpu.memory_space<vmem>>, vector<1x288x4xf32>
    %73 = vector.shape_cast %72 : vector<1x288x4xf32> to vector<288x4xf32>
    %74 = arith.truncf %73 : vector<288x4xf32> to vector<288x4xbf16>
    %c6 = arith.constant 6 : index
    %c0_69 = arith.constant 0 : index
    %c0_70 = arith.constant 0 : index
    %75 = vector.load %arg3[%c6, %c0_69, %c0_70] : memref<9x4x128xbf16, #tpu.memory_space<vmem>>, vector<1x4x128xbf16>
    %76 = vector.shape_cast %75 : vector<1x4x128xbf16> to vector<4x128xbf16>
    %cst_71 = arith.constant dense<0.000000e+00> : vector<288x128xf32>
    %77 = tpu.matmul %74, %76, %cst_71 {dimension_numbers = #tpu.dot_dimension_numbers<[1], [0], [0], [1], [0, 0, 1, 1], [], []>} : vector<288x4xbf16>, vector<4x128xbf16>, vector<288x128xf32> -> vector<288x128xf32>
    %c0_72 = arith.constant 0 : index
    %c0_73 = arith.constant 0 : index
    %c0_74 = arith.constant 0 : index
    %78 = vector.load %arg5[%c0_72, %c0_73, %c0_74] : memref<1x288x128xf32, #tpu.memory_space<vmem>>, vector<1x288x128xf32>
    %79 = vector.shape_cast %78 : vector<1x288x128xf32> to vector<288x128xf32>
    %80 = arith.addf %79, %77 : vector<288x128xf32>
    %c0_75 = arith.constant 0 : index
    %c0_76 = arith.constant 0 : index
    %c0_77 = arith.constant 0 : index
    %81 = vector.load %arg5[%c0_75, %c0_76, %c0_77] : memref<1x288x128xf32, #tpu.memory_space<vmem>>, vector<1x288x128xf32>
    %82 = vector.shape_cast %81 : vector<1x288x128xf32> to vector<288x128xf32>
    %83 = vector.shape_cast %80 : vector<288x128xf32> to vector<1x288x128xf32>
    tpu.vector_store %arg5[%c0_75, %c0_76, %c0_77], %83 {strides = array<i32>} : memref<1x288x128xf32, #tpu.memory_space<vmem>>, vector<1x288x128xf32>,
    %c0_78 = arith.constant 0 : index
    %c37 = arith.constant 37 : index
    %c0_79 = arith.constant 0 : index
    %84 = vector.load %arg2[%c0_78, %c37, %c0_79] : memref<1x342x4xf32, #tpu.memory_space<vmem>>, vector<1x288x4xf32>
    %85 = vector.shape_cast %84 : vector<1x288x4xf32> to vector<288x4xf32>
    %86 = arith.truncf %85 : vector<288x4xf32> to vector<288x4xbf16>
    %c7 = arith.constant 7 : index
    %c0_80 = arith.constant 0 : index
    %c0_81 = arith.constant 0 : index
    %87 = vector.load %arg3[%c7, %c0_80, %c0_81] : memref<9x4x128xbf16, #tpu.memory_space<vmem>>, vector<1x4x128xbf16>
    %88 = vector.shape_cast %87 : vector<1x4x128xbf16> to vector<4x128xbf16>
    %cst_82 = arith.constant dense<0.000000e+00> : vector<288x128xf32>
    %89 = tpu.matmul %86, %88, %cst_82 {dimension_numbers = #tpu.dot_dimension_numbers<[1], [0], [0], [1], [0, 0, 1, 1], [], []>} : vector<288x4xbf16>, vector<4x128xbf16>, vector<288x128xf32> -> vector<288x128xf32>
    %c0_83 = arith.constant 0 : index
    %c0_84 = arith.constant 0 : index
    %c0_85 = arith.constant 0 : index
    %90 = vector.load %arg5[%c0_83, %c0_84, %c0_85] : memref<1x288x128xf32, #tpu.memory_space<vmem>>, vector<1x288x128xf32>
    %91 = vector.shape_cast %90 : vector<1x288x128xf32> to vector<288x128xf32>
    %92 = arith.addf %91, %89 : vector<288x128xf32>
    %c0_86 = arith.constant 0 : index
    %c0_87 = arith.constant 0 : index
    %c0_88 = arith.constant 0 : index
    %93 = vector.load %arg5[%c0_86, %c0_87, %c0_88] : memref<1x288x128xf32, #tpu.memory_space<vmem>>, vector<1x288x128xf32>
    %94 = vector.shape_cast %93 : vector<1x288x128xf32> to vector<288x128xf32>
    %95 = vector.shape_cast %92 : vector<288x128xf32> to vector<1x288x128xf32>
    tpu.vector_store %arg5[%c0_86, %c0_87, %c0_88], %95 {strides = array<i32>} : memref<1x288x128xf32, #tpu.memory_space<vmem>>, vector<1x288x128xf32>,
    %c0_89 = arith.constant 0 : index
    %c38 = arith.constant 38 : index
    %c0_90 = arith.constant 0 : index
    %96 = vector.load %arg2[%c0_89, %c38, %c0_90] : memref<1x342x4xf32, #tpu.memory_space<vmem>>, vector<1x288x4xf32>
    %97 = vector.shape_cast %96 : vector<1x288x4xf32> to vector<288x4xf32>
    %98 = arith.truncf %97 : vector<288x4xf32> to vector<288x4xbf16>
    %c8 = arith.constant 8 : index
    %c0_91 = arith.constant 0 : index
    %c0_92 = arith.constant 0 : index
    %99 = vector.load %arg3[%c8, %c0_91, %c0_92] : memref<9x4x128xbf16, #tpu.memory_space<vmem>>, vector<1x4x128xbf16>
    %100 = vector.shape_cast %99 : vector<1x4x128xbf16> to vector<4x128xbf16>
    %cst_93 = arith.constant dense<0.000000e+00> : vector<288x128xf32>
    %101 = tpu.matmul %98, %100, %cst_93 {dimension_numbers = #tpu.dot_dimension_numbers<[1], [0], [0], [1], [0, 0, 1, 1], [], []>} : vector<288x4xbf16>, vector<4x128xbf16>, vector<288x128xf32> -> vector<288x128xf32>
    %c0_94 = arith.constant 0 : index
    %c0_95 = arith.constant 0 : index
    %c0_96 = arith.constant 0 : index
    %102 = vector.load %arg5[%c0_94, %c0_95, %c0_96] : memref<1x288x128xf32, #tpu.memory_space<vmem>>, vector<1x288x128xf32>
    %103 = vector.shape_cast %102 : vector<1x288x128xf32> to vector<288x128xf32>
    %104 = arith.addf %103, %101 : vector<288x128xf32>
    %c0_97 = arith.constant 0 : index
    %c0_98 = arith.constant 0 : index
    %c0_99 = arith.constant 0 : index
    %105 = vector.load %arg5[%c0_97, %c0_98, %c0_99] : memref<1x288x128xf32, #tpu.memory_space<vmem>>, vector<1x288x128xf32>
    %106 = vector.shape_cast %105 : vector<1x288x128xf32> to vector<288x128xf32>
    %107 = vector.shape_cast %104 : vector<288x128xf32> to vector<1x288x128xf32>
    tpu.vector_store %arg5[%c0_97, %c0_98, %c0_99], %107 {strides = array<i32>} : memref<1x288x128xf32, #tpu.memory_space<vmem>>, vector<1x288x128xf32>,
    %c0_100 = arith.constant 0 : index
    %c0_101 = arith.constant 0 : index
    %c0_102 = arith.constant 0 : index
    %108 = vector.load %arg5[%c0_100, %c0_101, %c0_102] : memref<1x288x128xf32, #tpu.memory_space<vmem>>, vector<1x288x128xf32>
    %cst_103 = arith.constant 0.000000e+00 : f32
    %109 = vector.broadcast %cst_103 : f32 to vector<1x288x128xf32>
    %110 = arith.maximumf %108, %109 : vector<1x288x128xf32>
    %c0_104 = arith.constant 0 : index
    %c0_105 = arith.constant 0 : index
    %c0_106 = arith.constant 0 : index
    %111 = vector.load %arg5[%c0_104, %c0_105, %c0_106] : memref<1x288x128xf32, #tpu.memory_space<vmem>>, vector<1x288x128xf32>
    tpu.vector_store %arg5[%c0_104, %c0_105, %c0_106], %110 {strides = array<i32>} : memref<1x288x128xf32, #tpu.memory_space<vmem>>, vector<1x288x128xf32>,
    return
  }
  func.func @transform_0(%arg0: i32, %arg1: i32) -> (i32, i32, i32) {
    %c0_i32 = arith.constant 0 : i32
    %c0_i32_0 = arith.constant 0 : i32
    %c0_i32_1 = arith.constant 0 : i32
    return %arg0, %c0_i32, %c0_i32_0 : i32, i32, i32
  }
  func.func @transform_1(%arg0: i32, %arg1: i32) -> (i32, i32, i32) {
    %c0_i32 = arith.constant 0 : i32
    %c0_i32_0 = arith.constant 0 : i32
    %c0_i32_1 = arith.constant 0 : i32
    return %c0_i32, %c0_i32_0, %arg1 : i32, i32, i32
  }
  func.func @transform_2(%arg0: i32, %arg1: i32) -> (i32, i32) {
    %c0_i32 = arith.constant 0 : i32
    %c0_i32_0 = arith.constant 0 : i32
    return %c0_i32, %arg1 : i32, i32
  }
  func.func @transform_3(%arg0: i32, %arg1: i32) -> (i32, i32, i32) {
    %c0_i32 = arith.constant 0 : i32
    %c0_i32_0 = arith.constant 0 : i32
    return %arg0, %c0_i32, %arg1 : i32, i32, i32
  }
}

</mosaic_0001>

<bundles_post_ra>
// kernel: a_call__.1
= control target key start
LH: loop header
LB: loop body
LE: loop exit
PB: predicated region body
PF: predicated region fallthrough
CT: control target
= control target key end

     0   :  { %s4731_s12 = smov 0   ;;  %s4733_s13 = smov 0   ;;  %s5837_s0 = inlined_call_operand.vmem [shape: f32[2,342,4], index: 0, kind: input, shape index: {}]   ;;  %s5838_s1 = inlined_call_operand.vmem [shape: bf16[9,4,128], index: 1, kind: input, shape index: {}]   ;;  %s5839_s2 = inlined_call_operand.vmem [shape: f32[1,128], index: 2, kind: input, shape index: {}]   ;;  %s5840_s3 = inlined_call_operand.vmem [shape: f32[2,288,128], index: 3, kind: output, shape index: {}]  }
   0x1   :  { %s4735_s14 = smov 0  }
   0x2 LB: > { %s25_s15 = sadd.s32 1, %s4705_s13  ;;  %p3960_p0 = scmp.ge.s32.totalorder %s4709_s14, 1  ;;  %s4709_s14 = sphi %s4735_s14, %s13_s14   ;;  %s4705_s13 = sphi %s4733_s13, %s5842_s13   ;;  %s4701_s12 = sphi %s4731_s12, %s5841_s12  }
   0x3   : > { %p27_p1 = scmp.ge.s32.totalorder %s25_s15, 2  ;;  %p168_p2 = scmp.lt.s32.totalorder %s4709_s14, 3 }
   0x5   : > { %s5844_s15 = smov (%p27_p1, %s25_s15), 0  ;;  %p169_p3 = pnand %p3960_p0, %p168_p2 }
   0x6   : > { %p202_p4 = scmp.lt.s32.totalorder (!%p169_p3), %s4701_s12, 1 }
   0x7   : > { %172 = sbr.rel (%p169_p3) target bundleno = 544 (0x220), region = 32 }
   0xc   : > { %v277_v0 = vld [vmem:[%s5838_s1] sm:$0x3]  ;;  %vm340_vm0 = vcmask 1041408   ;;  %v3982_v2 = vld [vmem:[%s5838_s1 + $0x2] sm:$0x3]  ;;  %s5846_s12 = smov (!%p202_p4, %s4701_s12), 1 }
   0xd   : > { %4652 = vmatprep.subr.msk.bf16.mxu1 %vm340_vm0, %v277_v0  ;;  %4651 = vmatprep.subr.msk.bf16.mxu0 %vm340_vm0, %v277_v0  ;;  %v342_v1 = vsel %vm340_vm0, %v277_v0, 0  ;;  %v4001_v3 = vld [vmem:[%s5838_s1 + $0x4] sm:$0x3]  ;;  %s4661_s22 = smul.u32 344, %s5846_s12  ;;  %vm285_vm1 = vcmask 31744   ;;  %v668_v18 = vsel %vm340_vm0, %v3982_v2, 0 }
   0xe   : > { %4650 = vmatpush3.bf16.msra.mxu1 %v342_v1  ;;  %4308 = vmatpush3.bf16.msra.mxu0 %v342_v1  ;;  %v1066_v15 = vsel %vm340_vm0, %v4001_v3, 0  ;;  %v4791_v24 = vld [vmem:[%s5838_s1 + $0x6] sm:$0x3]  ;;  %v4796_v25 = vld [vmem:[%s5838_s1 + $0x8] sm:$0x3]  ;;  %s4662_s17 = smul.u32 288, %s5846_s12 }
   0xf   : > { %4653 = vmatprep.subr.msk.bf16.mxu1 %vm340_vm0, %v3982_v2  ;;  %4654 = vmatprep.subr.msk.bf16.mxu0 %vm340_vm0, %v4001_v3  ;;  %s4769_s25 = scalar_lea.vmem %s5837_s0, %s4661_s22 }
  0x10   : > { %v223_v4 = vld [vmem:[%s4769_s25] sm:$0xff]  ;;  %v224_v5 = vld [vmem:[%s4769_s25 + $0x8] sm:$0xff]  ;;  %v225_v9 = vld [vmem:[%s4769_s25 + $0x10] sm:$0xff]  ;;  %s5756_s20 = scalar_lea.vmem %s5840_s3, %s4662_s17 }
  0x11   : > { %v243_v6 = vld [vmem:[%s4769_s25 + $0xa0] sm:$0xff]  ;;  %v259_v7 = vpack.c.bf16 %v224_v5, %v223_v4  ;;  %v244_v8 = vld [vmem:[%s4769_s25 + $0xa8] sm:$0xff]  ;;  %v226_v10 = vld [vmem:[%s4769_s25 + $0x18] sm:$0xff] }
  0x12   : > { %v269_v11 = vpack.c.bf16 %v244_v8, %v243_v6  ;;  %v260_v12 = vpack.c.bf16 %v226_v10, %v225_v9  ;;  %v245_v13 = vld [vmem:[%s4769_s25 + $0xb0] sm:$0xff]  ;;  %v246_v14 = vld [vmem:[%s4769_s25 + $0xb8] sm:$0xff]  ;;  %v227_v16 = vld [vmem:[%s4769_s25 + $0x20] sm:$0xff]  ;;  %v1464_v10 = vsel %vm340_vm0, %v4791_v24, 0 }
  0x13   : > { %4309 = vmatprep.mubr.msk.bf16.mxu0 %vm285_vm1, %v259_v7  ;;  %v270_v17 = vpack.c.bf16 %v246_v14, %v245_v13  ;;  %v228_v19 = vld [vmem:[%s4769_s25 + $0x28] sm:$0xff]  ;;  %v247_v20 = vld [vmem:[%s4769_s25 + $0xc0] sm:$0xff]  ;;  %v229_v26 = vld [vmem:[%s4769_s25 + $0x30] sm:$0xff] }
  0x14   : > { %v248_v21 = vld [vmem:[%s4769_s25 + $0xc8] sm:$0xff]  ;;  %4329 = vmatprep.mubr.msk.bf16.mxu1 %vm285_vm1, %v269_v11  ;;  %4310 = vmatmul.mubr.msk.bf16.vlgmr.msra.gmra.mxu0 %vm285_vm1, %v260_v12  ;;  %v261_v22 = vpack.c.bf16 %v228_v19, %v227_v16  ;;  %v230_v27 = vld [vmem:[%s4769_s25 + $0x38] sm:$0xff]  ;;  %v249_v28 = vld [vmem:[%s4769_s25 + $0xd0] sm:$0xff] }
  0x15   : > { %v271_v23 = vpack.c.bf16 %v248_v21, %v247_v20  ;;  %4330 = vmatmul.mubr.msk.bf16.vlgmr.msra.gmra.mxu1 %vm285_vm1, %v270_v17  ;;  %4384 = vmatpush3.bf16.msra.mxu0 %v1066_v15  ;;  %v250_v29 = vld [vmem:[%s4769_s25 + $0xd8] sm:$0xff]  ;;  %v231_v30 = vld [vmem:[%s4769_s25 + $0x40] sm:$0xff]  ;;  %v232_v31 = vld [vmem:[%s4769_s25 + $0x48] sm:$0xff]  ;;  %v262_v34 = vpack.c.bf16 %v230_v27, %v229_v26 }
  0x16   : > { %4346 = vmatpush3.bf16.msra.mxu1 %v668_v18  ;;  %4313 = vmatprep.mubr.msk.bf16.mxu0 %vm285_vm1, %v261_v22  ;;  %v251_v32 = vld [vmem:[%s4769_s25 + $0xe0] sm:$0xff]  ;;  %v252_v33 = vld [vmem:[%s4769_s25 + $0xe8] sm:$0xff]  ;;  %v272_v35 = vpack.c.bf16 %v250_v29, %v249_v28  ;;  %v263_v36 = vpack.c.bf16 %v232_v31, %v231_v30  ;;  %v233_v38 = vld [vmem:[%s4769_s25 + $0x50] sm:$0xff]  ;;  %v1862_v22 = vsel %vm340_vm0, %v4796_v25, 0 }
  0x17   : > { %4333 = vmatprep.mubr.msk.bf16.mxu1 %vm285_vm1, %v271_v23  ;;  %4655 = vmatprep.subr.msk.bf16.mxu1 %vm340_vm0, %v4791_v24  ;;  %v273_v37 = vpack.c.bf16 %v252_v33, %v251_v32  ;;  %v234_v39 = vld [vmem:[%s4769_s25 + $0x58] sm:$0xff]  ;;  %v253_v40 = vld [vmem:[%s4769_s25 + $0xf0] sm:$0xff]  ;;  %v235_v42 = vld [vmem:[%s4769_s25 + $0x60] sm:$0xff] }
  0x18   : > { %4656 = vmatprep.subr.msk.bf16.mxu0 %vm340_vm0, %v4796_v25  ;;  %v254_v41 = vld [vmem:[%s4769_s25 + $0xf8] sm:$0xff]  ;;  %v236_v43 = vld [vmem:[%s4769_s25 + $0x68] sm:$0xff]  ;;  %v255_v44 = vld [vmem:[%s4769_s25 + $0x100] sm:$0xff]  ;;  %v264_v46 = vpack.c.bf16 %v234_v39, %v233_v38 }
  0x19   : > { %v256_v45 = vld [vmem:[%s4769_s25 + $0x108] sm:$0xff]  ;;  %v274_v47 = vpack.c.bf16 %v254_v41, %v253_v40  ;;  %v265_v48 = vpack.c.bf16 %v236_v43, %v235_v42  ;;  %v237_v50 = vld [vmem:[%s4769_s25 + $0x70] sm:$0xff]  ;;  %v238_v51 = vld [vmem:[%s4769_s25 + $0x78] sm:$0xff] }
  0x1a   : > { %v275_v49 = vpack.c.bf16 %v256_v45, %v255_v44  ;;  %v257_v52 = vld [vmem:[%s4769_s25 + $0x110] sm:$0xff]  ;;  %v258_v53 = vld [vmem:[%s4769_s25 + $0x118] sm:$0xff]  ;;  %v239_v54 = vld [vmem:[%s4769_s25 + $0x80] sm:$0xff]  ;;  %v266_v58 = vpack.c.bf16 %v238_v51, %v237_v50 }
  0x1b   : > { %v240_v55 = vld [vmem:[%s4769_s25 + $0x88] sm:$0xff]  ;;  %v276_v59 = vpack.c.bf16 %v258_v53, %v257_v52  ;;  %v241_v62 = vld [vmem:[%s4769_s25 + $0x90] sm:$0xff]  ;;  %v242_v63 = vld [vmem:[%s4769_s25 + $0x98] sm:$0xff] }
  0x1c   : > { %4314 = vmatmul.mubr.msk.bf16.gmra.mxu0 %vm285_vm1, %v262_v34  ;;  %v557_v56 = vld [vmem:[%s4769_s25 + $0x1] sm:$0xff]  ;;  %v558_v57 = vld [vmem:[%s4769_s25 + $0x9] sm:$0xff]  ;;  %v267_v60 = vpack.c.bf16 %v240_v55, %v239_v54  ;;  %v559_v0 = vld [vmem:[%s4769_s25 + $0x11] sm:$0xff]  ;;  %v268_v6 = vpack.c.bf16 %v242_v63, %v241_v62 }
  0x1d   : > { %4334 = vmatmul.mubr.msk.bf16.gmra.mxu1 %vm285_vm1, %v272_v35  ;;  %4317 = vmatprep.mubr.msk.bf16.mxu0 %vm285_vm1, %v263_v36  ;;  %v593_v61 = vpack.c.bf16 %v558_v57, %v557_v56  ;;  %v560_v1 = vld [vmem:[%s4769_s25 + $0x19] sm:$0xff]  ;;  %v955_v2 = vld [vmem:[%s4769_s25 + $0x2] sm:$0xff]  ;;  %v956_v3 = vld [vmem:[%s4769_s25 + $0xa] sm:$0xff] }
  0x1e   : > { %4337 = vmatprep.mubr.msk.bf16.mxu1 %vm285_vm1, %v273_v37  ;;  %v561_v4 = vld [vmem:[%s4769_s25 + $0x21] sm:$0xff]  ;;  %v562_v5 = vld [vmem:[%s4769_s25 + $0x29] sm:$0xff]  ;;  %v594_v7 = vpack.c.bf16 %v560_v1, %v559_v0  ;;  %v991_v8 = vpack.c.bf16 %v956_v3, %v955_v2  ;;  %v957_v12 = vld [vmem:[%s4769_s25 + $0x12] sm:$0xff] }
  0x1f   : > { %v595_v9 = vpack.c.bf16 %v562_v5, %v561_v4  ;;  %v4855_v11 = vld [vmem:[%s5838_s1 + $0xa] sm:$0x3]  ;;  %v958_v13 = vld [vmem:[%s4769_s25 + $0x1a] sm:$0xff]  ;;  %v563_v14 = vld [vmem:[%s4769_s25 + $0x31] sm:$0xff] }
  0x20   : > { %v564_v15 = vld [vmem:[%s4769_s25 + $0x39] sm:$0xff]  ;;  %v565_v16 = vld [vmem:[%s4769_s25 + $0x41] sm:$0xff]  ;;  %v566_v17 = vld [vmem:[%s4769_s25 + $0x49] sm:$0xff]  ;;  %v4870_v20 = vpack.c.bf16 %v958_v13, %v957_v12 }
  0x21   : > { %v959_v18 = vld [vmem:[%s4769_s25 + $0x22] sm:$0xff]  ;;  %v960_v19 = vld [vmem:[%s4769_s25 + $0x2a] sm:$0xff]  ;;  %v596_v21 = vpack.c.bf16 %v564_v15, %v563_v14  ;;  %v597_v23 = vpack.c.bf16 %v566_v17, %v565_v16  ;;  %v961_v28 = vld [vmem:[%s4769_s25 + $0x32] sm:$0xff] }
  0x22   : > { %v4874_v24 = vpack.c.bf16 %v960_v19, %v959_v18  ;;  %v4881_v26 = vld [vmem:[%s5838_s1 + $0xc] sm:$0x3]  ;;  %v567_v27 = vld [vmem:[%s4769_s25 + $0x51] sm:$0xff]  ;;  %v962_v29 = vld [vmem:[%s4769_s25 + $0x3a] sm:$0xff] }
  0x23   : > { %v568_v25 = vld [vmem:[%s4769_s25 + $0x59] sm:$0xff]  ;;  %v963_v30 = vld [vmem:[%s4769_s25 + $0x42] sm:$0xff]  ;;  %v964_v31 = vld [vmem:[%s4769_s25 + $0x4a] sm:$0xff]  ;;  %v4897_v34 = vpack.c.bf16 %v962_v29, %v961_v28 }
  0x24   : > { %4318 = vmatmul.mubr.msk.bf16.gmra.mxu0 %vm285_vm1, %v264_v46  ;;  %v569_v32 = vld [vmem:[%s4769_s25 + $0x61] sm:$0xff]  ;;  %v570_v33 = vld [vmem:[%s4769_s25 + $0x69] sm:$0xff]  ;;  %v598_v35 = vpack.c.bf16 %v568_v25, %v567_v27  ;;  %v4899_v36 = vpack.c.bf16 %v964_v31, %v963_v30  ;;  %v571_v38 = vld [vmem:[%s4769_s25 + $0x71] sm:$0xff] }
  0x25   : > { %4338 = vmatmul.mubr.msk.bf16.gmra.mxu1 %vm285_vm1, %v274_v47  ;;  %4321 = vmatprep.mubr.msk.bf16.mxu0 %vm285_vm1, %v265_v48  ;;  %v599_v37 = vpack.c.bf16 %v570_v33, %v569_v32  ;;  %v965_v39 = vld [vmem:[%s4769_s25 + $0x52] sm:$0xff]  ;;  %v966_v40 = vld [vmem:[%s4769_s25 + $0x5a] sm:$0xff]  ;;  %v967_v42 = vld [vmem:[%s4769_s25 + $0x62] sm:$0xff] }
  0x26   : > { %4341 = vmatprep.mubr.msk.bf16.mxu1 %vm285_vm1, %v275_v49  ;;  %v572_v41 = vld [vmem:[%s4769_s25 + $0x79] sm:$0xff]  ;;  %v968_v43 = vld [vmem:[%s4769_s25 + $0x6a] sm:$0xff]  ;;  %v573_v44 = vld [vmem:[%s4769_s25 + $0x81] sm:$0xff]  ;;  %v4915_v46 = vpack.c.bf16 %v966_v40, %v965_v39 }
  0x27   : > { %v574_v45 = vld [vmem:[%s4769_s25 + $0x89] sm:$0xff]  ;;  %v600_v47 = vpack.c.bf16 %v572_v41, %v571_v38  ;;  %v4917_v48 = vpack.c.bf16 %v968_v43, %v967_v42  ;;  %v575_v50 = vld [vmem:[%s4769_s25 + $0x91] sm:$0xff]  ;;  %v970_v52 = vld [vmem:[%s4769_s25 + $0x7a] sm:$0xff] }
  0x28   : > { %v601_v49 = vpack.c.bf16 %v574_v45, %v573_v44  ;;  %v969_v51 = vld [vmem:[%s4769_s25 + $0x72] sm:$0xff]  ;;  %v971_v54 = vld [vmem:[%s4769_s25 + $0x82] sm:$0xff]  ;;  %v972_v55 = vld [vmem:[%s4769_s25 + $0x8a] sm:$0xff] }
  0x29   : > { %v576_v53 = vld [vmem:[%s4769_s25 + $0x99] sm:$0xff]  ;;  %v577_v56 = vld [vmem:[%s4769_s25 + $0xa1] sm:$0xff]  ;;  %v578_v57 = vld [vmem:[%s4769_s25 + $0xa9] sm:$0xff] }
  0x2a   : > { %v579_v62 = vld [vmem:[%s4769_s25 + $0xb1] sm:$0xff]  ;;  %v974_v0 = vld [vmem:[%s4769_s25 + $0x9a] sm:$0xff]  ;;  %v975_v2 = vld [vmem:[%s4769_s25 + $0xa2] sm:$0xff] }
  0x2b   : > { %v973_v63 = vld [vmem:[%s4769_s25 + $0x92] sm:$0xff]  ;;  %v976_v3 = vld [vmem:[%s4769_s25 + $0xaa] sm:$0xff]  ;;  %v581_v4 = vld [vmem:[%s4769_s25 + $0xc1] sm:$0xff] }
  0x2c   : > { %4322 = vmatmul.mubr.msk.bf16.gmra.mxu0 %vm285_vm1, %v266_v58  ;;  %v4933_v58 = vpack.c.bf16 %v970_v52, %v969_v51  ;;  %v580_v1 = vld [vmem:[%s4769_s25 + $0xb9] sm:$0xff]  ;;  %v582_v5 = vld [vmem:[%s4769_s25 + $0xc9] sm:$0xff]  ;;  %v585_v17 = vld [vmem:[%s4769_s25 + $0xe1] sm:$0xff] }
  0x2d   : > { %4342 = vmatmul.mubr.msk.bf16.gmra.mxu1 %vm285_vm1, %v276_v59  ;;  %4325 = vmatprep.mubr.msk.bf16.mxu0 %vm285_vm1, %v267_v60  ;;  %v602_v59 = vpack.c.bf16 %v576_v53, %v575_v50  ;;  %v4935_v60 = vpack.c.bf16 %v972_v55, %v971_v54  ;;  %v977_v12 = vld [vmem:[%s4769_s25 + $0xb2] sm:$0xff]  ;;  %v978_v13 = vld [vmem:[%s4769_s25 + $0xba] sm:$0xff]  ;;  %v979_v15 = vld [vmem:[%s4769_s25 + $0xc2] sm:$0xff] }
  0x2e   : > { %4347 = vmatprep.mubr.msk.bf16.mxu1 %vm285_vm1, %v593_v61  ;;  %v603_v61 = vpack.c.bf16 %v578_v57, %v577_v56  ;;  %v584_v14 = vld [vmem:[%s4769_s25 + $0xd9] sm:$0xff]  ;;  %v980_v16 = vld [vmem:[%s4769_s25 + $0xca] sm:$0xff]  ;;  %v4969_v19 = vpack.c.bf16 %v978_v13, %v977_v12  ;;  %v983_v30 = vld [vmem:[%s4769_s25 + $0xe2] sm:$0xff]  ;;  %v2260_v57 = vsel %vm340_vm0, %v4855_v11, 0 }
  0x2f   : > { %v586_v18 = vld [vmem:[%s4769_s25 + $0xe9] sm:$0xff]  ;;  %v587_v27 = vld [vmem:[%s4769_s25 + $0xf1] sm:$0xff]  ;;  %v982_v29 = vld [vmem:[%s4769_s25 + $0xda] sm:$0xff] }
  0x30   : > { %v981_v28 = vld [vmem:[%s4769_s25 + $0xd2] sm:$0xff]  ;;  %v984_v31 = vld [vmem:[%s4769_s25 + $0xea] sm:$0xff]  ;;  %v589_v32 = vld [vmem:[%s4769_s25 + $0x101] sm:$0xff] }
  0x31   : > { %v588_v25 = vld [vmem:[%s4769_s25 + $0xf9] sm:$0xff]  ;;  %v590_v33 = vld [vmem:[%s4769_s25 + $0x109] sm:$0xff]  ;;  %v4989_v38 = vpack.c.bf16 %v984_v31, %v983_v30  ;;  %v591_v40 = vld [vmem:[%s4769_s25 + $0x111] sm:$0xff] }
  0x32   : > { %v609_v39 = vpack.c.bf16 %v590_v33, %v589_v32  ;;  %v985_v41 = vld [vmem:[%s4769_s25 + $0xf2] sm:$0xff]  ;;  %v986_v42 = vld [vmem:[%s4769_s25 + $0xfa] sm:$0xff]  ;;  %v987_v44 = vld [vmem:[%s4769_s25 + $0x102] sm:$0xff] }
  0x33   : > { %v592_v43 = vld [vmem:[%s4769_s25 + $0x119] sm:$0xff]  ;;  %v988_v45 = vld [vmem:[%s4769_s25 + $0x10a] sm:$0xff] }
  0x34   : > { %4326 = vmatmul.mubr.msk.bf16.gmra.mxu0 %vm285_vm1, %v268_v6  ;;  %v4951_v6 = vpack.c.bf16 %v974_v0, %v973_v63  ;;  %v5005_v50 = vpack.c.bf16 %v988_v45, %v987_v44  ;;  %v989_v51 = vld [vmem:[%s4769_s25 + $0x112] sm:$0xff]  ;;  %v990_v52 = vld [vmem:[%s4769_s25 + $0x11a] sm:$0xff] }
  0x35   : > { %4348 = vmatmul.mubr.msk.bf16.vlgmr.msra.gmra.mxu1 %vm285_vm1, %v594_v7  ;;  %4385 = vmatprep.mubr.msk.bf16.mxu0 %vm285_vm1, %v991_v8  ;;  %v604_v7 = vpack.c.bf16 %v580_v1, %v579_v62  ;;  %v4953_v8 = vpack.c.bf16 %v976_v3, %v975_v2  ;;  %v1751_v53 = vld [vmem:[%s4769_s25 + $0x13] sm:$0xff]  ;;  %v1752_v54 = vld [vmem:[%s4769_s25 + $0x1b] sm:$0xff]  ;;  %v5018_v55 = vpack.c.bf16 %v990_v52, %v989_v51  ;;  %v5046_v1 = vld [vmem:[%s5838_s1 + $0x10] sm:$0x3] }
  0x36   : > { %4422 = vmatpush3.bf16.msra.mxu1 %v1464_v10  ;;  %4351 = vmatprep.mubr.msk.bf16.mxu1 %vm285_vm1, %v595_v9  ;;  %v605_v9 = vpack.c.bf16 %v582_v5, %v581_v4  ;;  %v583_v10 = vld [vmem:[%s4769_s25 + $0xd1] sm:$0xff]  ;;  %v1787_v56 = vpack.c.bf16 %v1752_v54, %v1751_v53  ;;  %v1756_v62 = vld [vmem:[%s4769_s25 + $0x3b] sm:$0xff]  ;;  %v1785_v51 = vld [vmem:[%s4769_s25 + $0x123] sm:$0xff] }
  0x37   : > { %4657 = vmatprep.subr.msk.bf16.mxu1 %vm340_vm0, %v4855_v11  ;;  %v1755_v11 = vld [vmem:[%s4769_s25 + $0x33] sm:$0xff]  ;;  %v1758_v2 = vld [vmem:[%s4769_s25 + $0x4b] sm:$0xff]  ;;  %v1760_v3 = vld [vmem:[%s4769_s25 + $0x5b] sm:$0xff] }
  0x38   : > { %v1789_v0 = vpack.c.bf16 %v1756_v62, %v1755_v11  ;;  %v1766_v13 = vld [vmem:[%s4769_s25 + $0x8b] sm:$0xff]  ;;  %v1779_v31 = vld [vmem:[%s4769_s25 + $0xf3] sm:$0xff]  ;;  %v1780_v32 = vld [vmem:[%s4769_s25 + $0xfb] sm:$0xff] }
  0x39   : > { %v1778_v30 = vld [vmem:[%s4769_s25 + $0xeb] sm:$0xff]  ;;  %v2150_v44 = vld [vmem:[%s4769_s25 + $0x1c] sm:$0xff] }
  0x3a   : > { %v1786_v52 = vld [vmem:[%s4769_s25 + $0x12b] sm:$0xff] }
  0x3b   : > { %v2151_v53 = vld [vmem:[%s4769_s25 + $0x24] sm:$0xff]  ;;  %v2152_v54 = vld [vmem:[%s4769_s25 + $0x2c] sm:$0xff] }
  0x3c   : > { %4386 = vmatmul.mubr.msk.bf16.vlgmr.msra.gmra.mxu0 %vm285_vm1, %v4870_v20  ;;  %v2155_v62 = vld [vmem:[%s4769_s25 + $0x44] sm:$0xff] }
  0x3d   : > { %4352 = vmatmul.mubr.msk.bf16.gmra.mxu1 %vm285_vm1, %v596_v21  ;;  %4460 = vmatpush3.bf16.msra.mxu0 %v1862_v22  ;;  %v606_v21 = vpack.c.bf16 %v584_v14, %v583_v10  ;;  %v4971_v22 = vpack.c.bf16 %v980_v16, %v979_v15  ;;  %v1768_v14 = vld [vmem:[%s4769_s25 + $0x9b] sm:$0xff] }
  0x3e   : > { %4355 = vmatprep.mubr.msk.bf16.mxu1 %vm285_vm1, %v597_v23  ;;  %4389 = vmatprep.mubr.msk.bf16.mxu0 %vm285_vm1, %v4874_v24  ;;  %v607_v23 = vpack.c.bf16 %v586_v18, %v585_v17  ;;  %v1770_v17 = vld [vmem:[%s4769_s25 + $0xab] sm:$0xff]  ;;  %v1772_v18 = vld [vmem:[%s4769_s25 + $0xbb] sm:$0xff] }
  0x3f   : > { %4658 = vmatprep.subr.msk.bf16.mxu0 %vm340_vm0, %v4881_v26 }
  0x44   : > { %4390 = vmatmul.mubr.msk.bf16.gmra.mxu0 %vm285_vm1, %v4897_v34 }
  0x45   : > { %4356 = vmatmul.mubr.msk.bf16.gmra.mxu1 %vm285_vm1, %v598_v35  ;;  %4393 = vmatprep.mubr.msk.bf16.mxu0 %vm285_vm1, %v4899_v36  ;;  %v4987_v35 = vpack.c.bf16 %v982_v29, %v981_v28  ;;  %v1776_v28 = vld [vmem:[%s4769_s25 + $0xdb] sm:$0xff] }
  0x46   : > { %4359 = vmatprep.mubr.msk.bf16.mxu1 %vm285_vm1, %v599_v37  ;;  %v608_v37 = vpack.c.bf16 %v588_v25, %v587_v27  ;;  %v1774_v27 = vld [vmem:[%s4769_s25 + $0xcb] sm:$0xff] }
  0x4c   : > { %4394 = vmatmul.mubr.msk.bf16.gmra.mxu0 %vm285_vm1, %v4915_v46 }
  0x4d   : > { %4360 = vmatmul.mubr.msk.bf16.gmra.mxu1 %vm285_vm1, %v600_v47  ;;  %4397 = vmatprep.mubr.msk.bf16.mxu0 %vm285_vm1, %v4917_v48  ;;  %v5003_v47 = vpack.c.bf16 %v986_v42, %v985_v41  ;;  %v1783_v41 = vld [vmem:[%s4769_s25 + $0x113] sm:$0xff]  ;;  %v1784_v42 = vld [vmem:[%s4769_s25 + $0x11b] sm:$0xff] }
  0x4e   : > { %4363 = vmatprep.mubr.msk.bf16.mxu1 %vm285_vm1, %v601_v49  ;;  %v610_v49 = vpack.c.bf16 %v592_v43, %v591_v40  ;;  %v1388_v40 = vld [vmem:[%s4769_s25 + $0x12a] sm:$0xff]  ;;  %v2149_v43 = vld [vmem:[%s4769_s25 + $0x14] sm:$0xff] }
  0x54   : > { %4398 = vmatmul.mubr.msk.bf16.gmra.mxu0 %vm285_vm1, %v4933_v58 }
  0x55   : > { %4364 = vmatmul.mubr.msk.bf16.gmra.mxu1 %vm285_vm1, %v602_v59  ;;  %4401 = vmatprep.mubr.msk.bf16.mxu0 %vm285_vm1, %v4935_v60  ;;  %v5027_v59 = vld [vmem:[%s5838_s1 + $0xe] sm:$0x3] }
  0x56   : > { %4367 = vmatprep.mubr.msk.bf16.mxu1 %vm285_vm1, %v603_v61  ;;  %v1754_v61 = vld [vmem:[%s4769_s25 + $0x2b] sm:$0xff]  ;;  %v3056_v11 = vsel %vm340_vm0, %v5027_v59, 0 }
  0x5c   : > { %4402 = vmatmul.mubr.msk.bf16.gmra.mxu0 %vm285_vm1, %v4951_v6 }
  0x5d   : > { %4368 = vmatmul.mubr.msk.bf16.gmra.mxu1 %vm285_vm1, %v604_v7  ;;  %4405 = vmatprep.mubr.msk.bf16.mxu0 %vm285_vm1, %v4953_v8  ;;  %v1763_v7 = vld [vmem:[%s4769_s25 + $0x73] sm:$0xff] }
  0x5e   : > { %4371 = vmatprep.mubr.msk.bf16.mxu1 %vm285_vm1, %v605_v9  ;;  %v1764_v9 = vld [vmem:[%s4769_s25 + $0x7b] sm:$0xff] }
  0x5f   : > { %v1793_v12 = vpack.c.bf16 %v1764_v9, %v1763_v7 }
  0x64   : > { %4406 = vmatmul.mubr.msk.bf16.gmra.mxu0 %vm285_vm1, %v4969_v19 }
  0x65   : > { %4372 = vmatmul.mubr.msk.bf16.gmra.mxu1 %vm285_vm1, %v606_v21  ;;  %4409 = vmatprep.mubr.msk.bf16.mxu0 %vm285_vm1, %v4971_v22 }
  0x66   : > { %4375 = vmatprep.mubr.msk.bf16.mxu1 %vm285_vm1, %v607_v23 }
  0x6c   : > { %4410 = vmatmul.mubr.msk.bf16.gmra.mxu0 %vm285_vm1, %v4987_v35 }
  0x6d   : > { %4376 = vmatmul.mubr.msk.bf16.gmra.mxu1 %vm285_vm1, %v608_v37  ;;  %4413 = vmatprep.mubr.msk.bf16.mxu0 %vm285_vm1, %v4989_v38  ;;  %v1387_v37 = vld [vmem:[%s4769_s25 + $0x122] sm:$0xff] }
  0x6e   : > { %4379 = vmatprep.mubr.msk.bf16.mxu1 %vm285_vm1, %v609_v39  ;;  %v1782_v39 = vld [vmem:[%s4769_s25 + $0x10b] sm:$0xff] }
  0x74   : > { %4414 = vmatmul.mubr.msk.bf16.gmra.mxu0 %vm285_vm1, %v5003_v47 }
  0x75   : > { %4380 = vmatmul.mubr.msk.bf16.gmra.mxu1 %vm285_vm1, %v610_v49  ;;  %4417 = vmatprep.mubr.msk.bf16.mxu0 %vm285_vm1, %v5005_v50  ;;  %v1803_v49 = vpack.c.bf16 %v1784_v42, %v1783_v41  ;;  %v2173_v42 = vld [vmem:[%s4769_s25 + $0xd4] sm:$0xff] }
  0x76   : > { %4423 = vmatprep.mubr.msk.bf16.mxu1 %vm285_vm1, %v4870_v20  ;;  %v1753_v20 = vld [vmem:[%s4769_s25 + $0x23] sm:$0xff] }
  0x77   : > { %v1788_v63 = vpack.c.bf16 %v1754_v61, %v1753_v20  ;;  %v2186_v20 = vpack.c.bf16 %v2152_v54, %v2151_v53  ;;  %v5231_v53 = vld [vmem:[%s5839_s2] ss:$0 sm:$0xff] }
  0x7c   : > { %4418 = vmatmul.mubr.msk.bf16.gmra.mxu0 %vm285_vm1, %v5018_v55 }
  0x7d   : > { %4424 = vmatmul.mubr.msk.bf16.vlgmr.msra.gmra.mxu1 %vm285_vm1, %v4874_v24  ;;  %4461 = vmatprep.mubr.msk.bf16.mxu0 %vm285_vm1, %v1787_v56  ;;  %v2658_v24 = vsel %vm340_vm0, %v4881_v26, 0  ;;  %v1759_v26 = vld [vmem:[%s4769_s25 + $0x53] sm:$0xff]  ;;  %v2154_v56 = vld [vmem:[%s4769_s25 + $0x3c] sm:$0xff] }
  0x7e   : > { %4498 = vmatpush3.bf16.msra.mxu1 %v2260_v57  ;;  %4427 = vmatprep.mubr.msk.bf16.mxu1 %vm285_vm1, %v4897_v34  ;;  %v1757_v34 = vld [vmem:[%s4769_s25 + $0x43] sm:$0xff]  ;;  %v1791_v5 = vpack.c.bf16 %v1760_v3, %v1759_v26  ;;  %v1804_v57 = vpack.c.bf16 %v1786_v52, %v1785_v51  ;;  %v2160_v3 = vld [vmem:[%s4769_s25 + $0x6c] sm:$0xff] }
  0x7f   : > { %4659 = vmatprep.subr.msk.bf16.mxu1 %vm340_vm0, %v5027_v59  ;;  %v1790_v4 = vpack.c.bf16 %v1758_v2, %v1757_v34  ;;  %v3454_v59 = vsel %vm340_vm0, %v5046_v1, 0  ;;  %v2159_v26 = vld [vmem:[%s4769_s25 + $0x64] sm:$0xff] }
  0x84   : > { %4462 = vmatmul.mubr.msk.bf16.vlgmr.msra.gmra.mxu0 %vm285_vm1, %v1788_v63  ;;  %v2156_v63 = vld [vmem:[%s4769_s25 + $0x4c] sm:$0xff] }
  0x85   : > { %4428 = vmatmul.mubr.msk.bf16.gmra.mxu1 %vm285_vm1, %v4899_v36  ;;  %4536 = vmatpush3.bf16.msra.mxu0 %v2658_v24  ;;  %v1761_v36 = vld [vmem:[%s4769_s25 + $0x63] sm:$0xff]  ;;  %v2157_v24 = vld [vmem:[%s4769_s25 + $0x54] sm:$0xff]  ;;  %v2188_v34 = vpack.c.bf16 %v2156_v63, %v2155_v62 }
  0x86   : > { %4431 = vmatprep.mubr.msk.bf16.mxu1 %vm285_vm1, %v4915_v46  ;;  %4465 = vmatprep.mubr.msk.bf16.mxu0 %vm285_vm1, %v1789_v0  ;;  %v1762_v46 = vld [vmem:[%s4769_s25 + $0x6b] sm:$0xff]  ;;  %v2158_v0 = vld [vmem:[%s4769_s25 + $0x5c] sm:$0xff] }
  0x87   : > { %4660 = vmatprep.subr.msk.bf16.mxu0 %vm340_vm0, %v5046_v1  ;;  %v1792_v10 = vpack.c.bf16 %v1762_v46, %v1761_v36  ;;  %v2189_v2 = vpack.c.bf16 %v2158_v0, %v2157_v24  ;;  %v2190_v36 = vpack.c.bf16 %v2160_v3, %v2159_v26  ;;  %v2178_v62 = vld [vmem:[%s4769_s25 + $0xfc] sm:$0xff] }
  0x8c   : > { %4466 = vmatmul.mubr.msk.bf16.gmra.mxu0 %vm285_vm1, %v1790_v4  ;;  %v2161_v4 = vld [vmem:[%s4769_s25 + $0x74] sm:$0xff] }
  0x8d   : > { %4432 = vmatmul.mubr.msk.bf16.gmra.mxu1 %vm285_vm1, %v4917_v48  ;;  %4469 = vmatprep.mubr.msk.bf16.mxu0 %vm285_vm1, %v1791_v5  ;;  %v1765_v48 = vld [vmem:[%s4769_s25 + $0x83] sm:$0xff] }
  0x8e   : > { %4435 = vmatprep.mubr.msk.bf16.mxu1 %vm285_vm1, %v4933_v58  ;;  %v1767_v58 = vld [vmem:[%s4769_s25 + $0x93] sm:$0xff]  ;;  %v1794_v15 = vpack.c.bf16 %v1766_v13, %v1765_v48  ;;  %v2162_v5 = vld [vmem:[%s4769_s25 + $0x7c] sm:$0xff] }
  0x8f   : > { %v1795_v16 = vpack.c.bf16 %v1768_v14, %v1767_v58  ;;  %v2191_v1 = vpack.c.bf16 %v2162_v5, %v2161_v4  ;;  %v2165_v13 = vld [vmem:[%s4769_s25 + $0x94] sm:$0xff]  ;;  %v2166_v58 = vld [vmem:[%s4769_s25 + $0x9c] sm:$0xff] }
  0x94   : > { %4470 = vmatmul.mubr.msk.bf16.gmra.mxu0 %vm285_vm1, %v1792_v10  ;;  %v2163_v10 = vld [vmem:[%s4769_s25 + $0x84] sm:$0xff] }
  0x95   : > { %4436 = vmatmul.mubr.msk.bf16.gmra.mxu1 %vm285_vm1, %v4935_v60  ;;  %4473 = vmatprep.mubr.msk.bf16.mxu0 %vm285_vm1, %v1793_v12  ;;  %v1769_v60 = vld [vmem:[%s4769_s25 + $0xa3] sm:$0xff]  ;;  %v2164_v12 = vld [vmem:[%s4769_s25 + $0x8c] sm:$0xff] }
  0x96   : > { %4439 = vmatprep.mubr.msk.bf16.mxu1 %vm285_vm1, %v4951_v6  ;;  %v1771_v6 = vld [vmem:[%s4769_s25 + $0xb3] sm:$0xff]  ;;  %v1796_v21 = vpack.c.bf16 %v1770_v17, %v1769_v60  ;;  %v2193_v17 = vpack.c.bf16 %v2166_v58, %v2165_v13 }
  0x97   : > { %v1797_v23 = vpack.c.bf16 %v1772_v18, %v1771_v6  ;;  %v2180_v58 = vld [vmem:[%s4769_s25 + $0x10c] sm:$0xff] }
  0x9c   : > { %4474 = vmatmul.mubr.msk.bf16.gmra.mxu0 %vm285_vm1, %v1794_v15 }
  0x9d   : > { %4440 = vmatmul.mubr.msk.bf16.gmra.mxu1 %vm285_vm1, %v4953_v8  ;;  %4477 = vmatprep.mubr.msk.bf16.mxu0 %vm285_vm1, %v1795_v16  ;;  %v1773_v8 = vld [vmem:[%s4769_s25 + $0xc3] sm:$0xff]  ;;  %v2192_v16 = vpack.c.bf16 %v2164_v12, %v2163_v10 }
  0x9e   : > { %4443 = vmatprep.mubr.msk.bf16.mxu1 %vm285_vm1, %v4969_v19  ;;  %v1775_v19 = vld [vmem:[%s4769_s25 + $0xd3] sm:$0xff]  ;;  %v1798_v29 = vpack.c.bf16 %v1774_v27, %v1773_v8  ;;  %v2167_v8 = vld [vmem:[%s4769_s25 + $0xa4] sm:$0xff] }
  0x9f   : > { %v1799_v25 = vpack.c.bf16 %v1776_v28, %v1775_v19  ;;  %v2168_v27 = vld [vmem:[%s4769_s25 + $0xac] sm:$0xff]  ;;  %v2169_v28 = vld [vmem:[%s4769_s25 + $0xb4] sm:$0xff] }
  0xa4   : > { %4478 = vmatmul.mubr.msk.bf16.gmra.mxu0 %vm285_vm1, %v1796_v21 }
  0xa5   : > { %4444 = vmatmul.mubr.msk.bf16.gmra.mxu1 %vm285_vm1, %v4971_v22  ;;  %4481 = vmatprep.mubr.msk.bf16.mxu0 %vm285_vm1, %v1797_v23  ;;  %v1777_v22 = vld [vmem:[%s4769_s25 + $0xe3] sm:$0xff] }
  0xa6   : > { %4447 = vmatprep.mubr.msk.bf16.mxu1 %vm285_vm1, %v4987_v35  ;;  %v1800_v33 = vpack.c.bf16 %v1778_v30, %v1777_v22  ;;  %v1801_v35 = vpack.c.bf16 %v1780_v32, %v1779_v31  ;;  %v2194_v30 = vpack.c.bf16 %v2168_v27, %v2167_v8  ;;  %v2182_v8 = vld [vmem:[%s4769_s25 + $0x11c] sm:$0xff] }
  0xac   : > { %4482 = vmatmul.mubr.msk.bf16.gmra.mxu0 %vm285_vm1, %v1798_v29  ;;  %v2170_v29 = vld [vmem:[%s4769_s25 + $0xbc] sm:$0xff] }
  0xad   : > { %4448 = vmatmul.mubr.msk.bf16.gmra.mxu1 %vm285_vm1, %v4989_v38  ;;  %4485 = vmatprep.mubr.msk.bf16.mxu0 %vm285_vm1, %v1799_v25  ;;  %v1781_v38 = vld [vmem:[%s4769_s25 + $0x103] sm:$0xff]  ;;  %v2195_v32 = vpack.c.bf16 %v2170_v29, %v2169_v28 }
  0xae   : > { %4451 = vmatprep.mubr.msk.bf16.mxu1 %vm285_vm1, %v5003_v47  ;;  %v1802_v45 = vpack.c.bf16 %v1782_v39, %v1781_v38  ;;  %v1406_v47 = vpack.c.bf16 %v1388_v40, %v1387_v37  ;;  %v2171_v39 = vld [vmem:[%s4769_s25 + $0xc4] sm:$0xff]  ;;  %v2172_v40 = vld [vmem:[%s4769_s25 + $0xcc] sm:$0xff] }
  0xb4   : > { %4486 = vmatmul.mubr.msk.bf16.gmra.mxu0 %vm285_vm1, %v1800_v33 }
  0xb5   : > { %4452 = vmatmul.mubr.msk.bf16.gmra.mxu1 %vm285_vm1, %v5005_v50  ;;  %4489 = vmatprep.mubr.msk.bf16.mxu0 %vm285_vm1, %v1801_v35  ;;  %v2185_v50 = vpack.c.bf16 %v2150_v44, %v2149_v43  ;;  %v2174_v43 = vld [vmem:[%s4769_s25 + $0xdc] sm:$0xff] }
  0xb6   : > { %4455 = vmatprep.mubr.msk.bf16.mxu1 %vm285_vm1, %v5018_v55  ;;  %v2153_v55 = vld [vmem:[%s4769_s25 + $0x34] sm:$0xff] }
  0xb7   : > { %v2187_v61 = vpack.c.bf16 %v2154_v56, %v2153_v55 }
  0xbc   : > { %4490 = vmatmul.mubr.msk.bf16.gmra.mxu0 %vm285_vm1, %v1802_v45 }
  0xbd   : > { %4456 = vmatmul.mubr.msk.bf16.gmra.mxu1 %vm285_vm1, %v1406_v47  ;;  %4493 = vmatprep.mubr.msk.bf16.mxu0 %vm285_vm1, %v1803_v49  ;;  %v2196_v47 = vpack.c.bf16 %v2172_v40, %v2171_v39 }
  0xbe   : > { %4499 = vmatprep.mubr.msk.bf16.mxu1 %vm285_vm1, %v2185_v50  ;;  %v2197_v50 = vpack.c.bf16 %v2174_v43, %v2173_v42 }
  0xc4   : > { %4494 = vmatmul.mubr.msk.bf16.gmra.mxu0 %vm285_vm1, %v1804_v57  ;;  %v2175_v57 = vld [vmem:[%s4769_s25 + $0xe4] sm:$0xff] }
  0xc5   : > { %4500 = vmatmul.mubr.msk.bf16.vlgmr.msra.gmra.mxu1 %vm285_vm1, %v2186_v20  ;;  %4537 = vmatprep.mubr.msk.bf16.mxu0 %vm285_vm1, %v2186_v20  ;;  %v2176_v20 = vld [vmem:[%s4769_s25 + $0xec] sm:$0xff] }
  0xc6   : > { %4574 = vmatpush3.bf16.msra.mxu1 %v3056_v11  ;;  %4503 = vmatprep.mubr.msk.bf16.mxu1 %vm285_vm1, %v2187_v61  ;;  %v2177_v11 = vld [vmem:[%s4769_s25 + $0xf4] sm:$0xff] }
  0xc7   : > { %v2199_v26 = vpack.c.bf16 %v2178_v62, %v2177_v11  ;;  %v2184_v11 = vld [vmem:[%s4769_s25 + $0x12c] sm:$0xff] }
  0xcc   : > { %4538 = vmatmul.mubr.msk.bf16.vlgmr.msra.gmra.mxu0 %vm285_vm1, %v2187_v61 }
  0xcd   : > { %4504 = vmatmul.mubr.msk.bf16.gmra.mxu1 %vm285_vm1, %v2188_v34  ;;  %4612 = vmatpush3.bf16.msra.mxu0 %v3454_v59 }
  0xce   : > { %4507 = vmatprep.mubr.msk.bf16.mxu1 %vm285_vm1, %v2189_v2  ;;  %4541 = vmatprep.mubr.msk.bf16.mxu0 %vm285_vm1, %v2188_v34  ;;  %v2198_v34 = vpack.c.bf16 %v2176_v20, %v2175_v57 }
  0xd4   : > { %v5153_v46 = vpop.f32.mrf.mxu0  ;;  %4542 = vmatmul.mubr.msk.bf16.gmra.mxu0 %vm285_vm1, %v2189_v2 }
  0xd5   : > { %v5156_v7 = vpop.f32.mrf.mxu1  ;;  %4508 = vmatmul.mubr.msk.bf16.gmra.mxu1 %vm285_vm1, %v2190_v36  ;;  %4545 = vmatprep.mubr.msk.bf16.mxu0 %vm285_vm1, %v2190_v36  ;;  %v387_v4 = vadd.f32 %v5153_v46, %v5231_v53  ;;  %v2179_v46 = vld [vmem:[%s4769_s25 + $0x104] sm:$0xff] }
  0xd6   : > { %v5160_v9 = vpop.f32.mrf.mxu0  ;;  %4511 = vmatprep.mubr.msk.bf16.mxu1 %vm285_vm1, %v2191_v1 }
  0xd7   : > { %v5165_v48 = vpop.f32.mrf.mxu1  ;;  %v379_v10 = vadd.f32 %v5231_v53, %v5160_v9 }
  0xd8   : > { %v5169_v14 = vpop.f32.mrf.mxu0 }
  0xd9   : > { %v5171_v15 = vpop.f32.mrf.mxu1  ;;  %v390_v27 = vadd.f32 %v5169_v14, %v5231_v53 }
  0xda   : > { %v5173_v60 = vpop.f32.mrf.mxu0 }
  0xdb   : > { %v5175_v6 = vpop.f32.mrf.mxu1  ;;  %v382_v9 = vadd.f32 %v5231_v53, %v5173_v60 }
  0xdc   : > { %v5177_v18 = vpop.f32.mrf.mxu0  ;;  %4546 = vmatmul.mubr.msk.bf16.gmra.mxu0 %vm285_vm1, %v2191_v1 }
  0xdd   : > { %v5180_v21 = vpop.f32.mrf.mxu1  ;;  %4512 = vmatmul.mubr.msk.bf16.gmra.mxu1 %vm285_vm1, %v2192_v16  ;;  %4549 = vmatprep.mubr.msk.bf16.mxu0 %vm285_vm1, %v2192_v16 }
  0xde   : > { %v5184_v23 = vpop.f32.mrf.mxu0  ;;  %4515 = vmatprep.mubr.msk.bf16.mxu1 %vm285_vm1, %v2193_v17 }
  0xdf   : > { %v5189_v19 = vpop.f32.mrf.mxu1  ;;  %v395_v60 = vadd.f32 %v5231_v53, %v5184_v23 }
  0xe0   : > { %v5193_v25 = vpop.f32.mrf.mxu0 }
  0xe1   : > { %v5195_v22 = vpop.f32.mrf.mxu1 }
  0xe2   : > { %v5197_v31 = vpop.f32.mrf.mxu0 }
  0xe3   : > { %v5199_v33 = vpop.f32.mrf.mxu1 }
  0xe4   : > { %v5201_v35 = vpop.f32.mrf.mxu0  ;;  %4550 = vmatmul.mubr.msk.bf16.gmra.mxu0 %vm285_vm1, %v2193_v17  ;;  %v2181_v17 = vld [vmem:[%s4769_s25 + $0x114] sm:$0xff] }
  0xe5   : > { %v5204_v37 = vpop.f32.mrf.mxu1  ;;  %4516 = vmatmul.mubr.msk.bf16.gmra.mxu1 %vm285_vm1, %v2194_v30  ;;  %4553 = vmatprep.mubr.msk.bf16.mxu0 %vm285_vm1, %v2194_v30  ;;  %v2201_v42 = vpack.c.bf16 %v2182_v8, %v2181_v17 }
  0xe6   : > { %v5208_v38 = vpop.f32.mrf.mxu0  ;;  %4519 = vmatprep.mubr.msk.bf16.mxu1 %vm285_vm1, %v2195_v32 }
  0xe7   : > { %v5213_v41 = vpop.f32.mrf.mxu1 }
  0xe8   : > { %v5217_v44 = vpop.f32.mrf.mxu0 }
  0xe9   : > { %v5219_v45 = vpop.f32.mrf.mxu1 }
  0xea   : > { %v5221_v49 = vpop.f32.mrf.mxu0 }
  0xeb   : > { %v5223_v51 = vpop.f32.mrf.mxu1 }
  0xec   : > { %v5225_v52 = vpop.f32.mrf.mxu0  ;;  %4554 = vmatmul.mubr.msk.bf16.gmra.mxu0 %vm285_vm1, %v2195_v32  ;;  %v2200_v32 = vpack.c.bf16 %v2180_v58, %v2179_v46  ;;  %v398_v46 = vadd.f32 %v5231_v53, %v5197_v31 }
  0xed   : > { %v4343_v54 = vpop.f32.mrf.mxu1  ;;  %4520 = vmatmul.mubr.msk.bf16.gmra.mxu1 %vm285_vm1, %v2196_v47  ;;  %4557 = vmatprep.mubr.msk.bf16.mxu0 %vm285_vm1, %v2196_v47  ;;  %v403_v47 = vadd.f32 %v5177_v18, %v5231_v53  ;;  %v2183_v18 = vld [vmem:[%s4769_s25 + $0x124] sm:$0xff] }
  0xee   : > { %v5236_v55 = vadd.f32 %v4343_v54, %v5231_v53  ;;  %v5238_v56 = vpop.f32.mrf.mxu0  ;;  %4523 = vmatprep.mubr.msk.bf16.mxu1 %vm285_vm1, %v2197_v50  ;;  %v2202_v23 = vpack.c.bf16 %v2184_v11, %v2183_v18  ;;  %v2950_v18 = vld [vmem:[%s4769_s25 + $0x4d] sm:$0xff]  ;;  %v422_v11 = vadd.f32 %v5217_v44, %v5231_v53  ;;  %v435_v44 = vadd.f32 %v5225_v52, %v5231_v53 }
  0xef   : > { %v506_v61 = vpop.f32.mrf.mxu1  ;;  %v427_v52 = vadd.f32 %v5231_v53, %v5238_v56 }
  0xf0   : > { %v5246_v63 = vadd.f32 %v5231_v53, %v506_v61  ;;  %v5248_v24 = vpop.f32.mrf.mxu0 }
  0xf1   : > { %v4344_v0 = vpop.f32.mrf.mxu1 }
  0xf2   : > { %v5251_v59 = vadd.f32 %v4344_v0, %v5231_v53  ;;  %v5253_v2 = vpop.f32.mrf.mxu0 }
  0xf3   : > { %v509_v3 = vpop.f32.mrf.mxu1 }
  0xf4   : > { %v5258_v5 = vadd.f32 %v5231_v53, %v509_v3  ;;  %v5260_v36 = vpop.f32.mrf.mxu0  ;;  %4558 = vmatmul.mubr.msk.bf16.gmra.mxu0 %vm285_vm1, %v2197_v50  ;;  %v406_v3 = vadd.f32 %v5193_v25, %v5231_v53  ;;  %v419_v25 = vadd.f32 %v5201_v35, %v5231_v53  ;;  %v411_v35 = vadd.f32 %v5231_v53, %v5208_v38 }
  0xf5   : > { %v4349_v1 = vpop.f32.mrf.mxu1  ;;  %4524 = vmatmul.mubr.msk.bf16.gmra.mxu1 %vm285_vm1, %v2198_v34  ;;  %4561 = vmatprep.mubr.msk.bf16.mxu0 %vm285_vm1, %v2198_v34  ;;  %v2945_v34 = vld [vmem:[%s4769_s25 + $0x25] sm:$0xff] }
  0xf6   : > { %v885_v12 = vadd.f32 %v4349_v1, %v387_v4  ;;  %v5267_v13 = vpop.f32.mrf.mxu0  ;;  %4527 = vmatprep.mubr.msk.bf16.mxu1 %vm285_vm1, %v2199_v26 }
  0xf7   : > { %v704_v16 = vpop.f32.mrf.mxu1 }
  0xf8   : > { %v883_v28 = vadd.f32 %v704_v16, %v379_v10  ;;  %v5276_v29 = vpop.f32.mrf.mxu0 }
  0xf9   : > { %v4350_v30 = vpop.f32.mrf.mxu1 }
  0xfa   : > { %v886_v39 = vadd.f32 %v4350_v30, %v390_v27  ;;  %v5280_v40 = vpop.f32.mrf.mxu0 }
  0xfb   : > { %v707_v43 = vpop.f32.mrf.mxu1 }
  0xfc   : > { %v884_v14 = vadd.f32 %v707_v43, %v382_v9  ;;  %v4387_v50 = vpop.f32.mrf.mxu0  ;;  %4562 = vmatmul.mubr.msk.bf16.gmra.mxu0 %vm285_vm1, %v2199_v26  ;;  %v2946_v26 = vld [vmem:[%s4769_s25 + $0x2d] sm:$0xff]  ;;  %v2947_v43 = vld [vmem:[%s4769_s25 + $0x35] sm:$0xff] }
  0xfd   : > { %v4353_v54 = vpop.f32.mrf.mxu1  ;;  %v5285_v57 = vadd.f32 %v4387_v50, %v885_v12  ;;  %4528 = vmatmul.mubr.msk.bf16.gmra.mxu1 %vm285_vm1, %v2200_v32  ;;  %4565 = vmatprep.mubr.msk.bf16.mxu0 %vm285_vm1, %v2200_v32  ;;  %v2981_v17 = vpack.c.bf16 %v2946_v26, %v2945_v34  ;;  %v2581_v9 = vld [vmem:[%s4769_s25 + $0x134] sm:$0xff]  ;;  %v3343_v50 = vld [vmem:[%s4769_s25 + $0x26] sm:$0xff] }
  0xfe   : > { %v889_v20 = vadd.f32 %v4353_v54, %v403_v47  ;;  %v1102_v61 = vpop.f32.mrf.mxu0  ;;  %4531 = vmatprep.mubr.msk.bf16.mxu1 %vm285_vm1, %v2201_v42  ;;  %v3344_v54 = vld [vmem:[%s4769_s25 + $0x2e] sm:$0xff] }
  0xff   : > { %v720_v62 = vpop.f32.mrf.mxu1  ;;  %v5294_v0 = vadd.f32 %v1102_v61, %v883_v28  ;;  %v2949_v61 = vld [vmem:[%s4769_s25 + $0x45] sm:$0xff] }
 0x100   : > { %v887_v4 = vadd.f32 %v720_v62, %v395_v60  ;;  %v4388_v1 = vpop.f32.mrf.mxu0 }
 0x101   : > { %v4354_v10 = vpop.f32.mrf.mxu1  ;;  %v5300_v12 = vadd.f32 %v4388_v1, %v886_v39  ;;  %v2582_v39 = vld [vmem:[%s4769_s25 + $0x13c] sm:$0xff] }
 0x102   : > { %v890_v58 = vadd.f32 %v4354_v10, %v406_v3  ;;  %v1105_v16 = vpop.f32.mrf.mxu0  ;;  %v2600_v26 = vpack.c.bf16 %v2582_v39, %v2581_v9  ;;  %v3379_v10 = vpack.c.bf16 %v3344_v54, %v3343_v50  ;;  %v3346_v9 = vld [vmem:[%s4769_s25 + $0x3e] sm:$0xff] }
 0x103   : > { %v723_v8 = vpop.f32.mrf.mxu1  ;;  %v5304_v27 = vadd.f32 %v1105_v16, %v884_v14  ;;  %v2983_v16 = vpack.c.bf16 %v2950_v18, %v2949_v61  ;;  %v2953_v54 = vld [vmem:[%s4769_s25 + $0x65] sm:$0xff]  ;;  %v438_v61 = vadd.f32 %v5248_v24, %v5231_v53  ;;  %v451_v24 = vadd.f32 %v5260_v36, %v5231_v53 }
 0x104   : > { %v888_v28 = vadd.f32 %v723_v8, %v398_v46  ;;  %v4391_v30 = vpop.f32.mrf.mxu0  ;;  %4566 = vmatmul.mubr.msk.bf16.gmra.mxu0 %vm285_vm1, %v2201_v42  ;;  %v2948_v42 = vld [vmem:[%s4769_s25 + $0x3d] sm:$0xff]  ;;  %v443_v36 = vadd.f32 %v5231_v53, %v5267_v13 }
 0x105   : > { %v4357_v32 = vpop.f32.mrf.mxu1  ;;  %v5309_v31 = vadd.f32 %v4391_v30, %v889_v20  ;;  %4532 = vmatmul.mubr.msk.bf16.gmra.mxu1 %vm285_vm1, %v2202_v23  ;;  %4569 = vmatprep.mubr.msk.bf16.mxu0 %vm285_vm1, %v2202_v23  ;;  %v2982_v1 = vpack.c.bf16 %v2948_v42, %v2947_v43  ;;  %v414_v23 = vadd.f32 %v5231_v53, %v5221_v49  ;;  %v3348_v42 = vld [vmem:[%s4769_s25 + $0x4e] sm:$0xff] }
 0x106   : > { %v893_v47 = vadd.f32 %v4357_v32, %v419_v25  ;;  %v1118_v14 = vpop.f32.mrf.mxu0  ;;  %4575 = vmatprep.mubr.msk.bf16.mxu1 %vm285_vm1, %v2981_v17  ;;  %v3345_v32 = vld [vmem:[%s4769_s25 + $0x36] sm:$0xff] }
 0x107   : > { %v736_v60 = vpop.f32.mrf.mxu1  ;;  %v5322_v20 = vadd.f32 %v1118_v14, %v887_v4  ;;  %v3347_v14 = vld [vmem:[%s4769_s25 + $0x46] sm:$0xff] }
 0x108   : > { %v891_v62 = vadd.f32 %v736_v60, %v411_v35  ;;  %v4392_v34 = vpop.f32.mrf.mxu0  ;;  %v2952_v35 = vld [vmem:[%s4769_s25 + $0x5d] sm:$0xff]  ;;  %v2954_v60 = vld [vmem:[%s4769_s25 + $0x6d] sm:$0xff] }
 0x109   : > { %v4358_v3 = vpop.f32.mrf.mxu1  ;;  %v5328_v38 = vadd.f32 %v4392_v34, %v890_v58  ;;  %v3380_v34 = vpack.c.bf16 %v3346_v9, %v3345_v32 }
 0x10a   : > { %v894_v4 = vadd.f32 %v4358_v3, %v422_v11  ;;  %v1121_v46 = vpop.f32.mrf.mxu0 }
 0x10b   : > { %v739_v17 = vpop.f32.mrf.mxu1  ;;  %v5332_v8 = vadd.f32 %v1121_v46, %v888_v28  ;;  %v2951_v28 = vld [vmem:[%s4769_s25 + $0x55] sm:$0xff]  ;;  %v2985_v46 = vpack.c.bf16 %v2954_v60, %v2953_v54  ;;  %v454_v54 = vadd.f32 %v5276_v29, %v5231_v53  ;;  %v467_v29 = vadd.f32 %v5156_v7, %v5231_v53 }
 0x10c   : > { %v892_v58 = vadd.f32 %v739_v17, %v414_v23  ;;  %v4395_v25 = vpop.f32.mrf.mxu0  ;;  %4570 = vmatmul.mubr.msk.bf16.gmra.mxu0 %vm285_vm1, %v2600_v26  ;;  %v2984_v3 = vpack.c.bf16 %v2952_v35, %v2951_v28  ;;  %v3350_v28 = vld [vmem:[%s4769_s25 + $0x5e] sm:$0xff]  ;;  %v3352_v35 = vld [vmem:[%s4769_s25 + $0x6e] sm:$0xff]  ;;  %v459_v7 = vadd.f32 %v5231_v53, %v5165_v48 }
 0x10d   : > { %v4361_v30 = vpop.f32.mrf.mxu1  ;;  %v5337_v49 = vadd.f32 %v4395_v25, %v893_v47  ;;  %4576 = vmatmul.mubr.msk.bf16.vlgmr.msra.gmra.mxu1 %vm285_vm1, %v2982_v1  ;;  %4613 = vmatprep.mubr.msk.bf16.mxu0 %vm285_vm1, %v3379_v10  ;;  %v3381_v1 = vpack.c.bf16 %v3348_v42, %v3347_v14  ;;  %v430_v10 = vadd.f32 %v5231_v53, %v5253_v2  ;;  %v2957_v42 = vld [vmem:[%s4769_s25 + $0x85] sm:$0xff] }
 0x10e   : > { %v897_v39 = vadd.f32 %v4361_v30, %v435_v44  ;;  %v1134_v43 = vpop.f32.mrf.mxu0  ;;  %4579 = vmatprep.mubr.msk.bf16.mxu1 %vm285_vm1, %v2983_v16  ;;  %v3349_v30 = vld [vmem:[%s4769_s25 + $0x56] sm:$0xff] }
 0x10f   : > { %v752_v47 = vpop.f32.mrf.mxu1  ;;  %v5350_v50 = vadd.f32 %v1134_v43, %v891_v62  ;;  %v3351_v43 = vld [vmem:[%s4769_s25 + $0x66] sm:$0xff] }
 0x110   : > { %v895_v18 = vadd.f32 %v752_v47, %v427_v52  ;;  %v4396_v11 = vpop.f32.mrf.mxu0  ;;  %v2956_v52 = vld [vmem:[%s4769_s25 + $0x7d] sm:$0xff]  ;;  %v2958_v47 = vld [vmem:[%s4769_s25 + $0x8d] sm:$0xff] }
 0x111   : > { %v4362_v26 = vpop.f32.mrf.mxu1  ;;  %v5356_v56 = vadd.f32 %v4396_v11, %v894_v4  ;;  %v3382_v11 = vpack.c.bf16 %v3350_v28, %v3349_v30 }
 0x112   : > { %v898_v62 = vadd.f32 %v4362_v26, %v438_v61  ;;  %v1137_v23 = vpop.f32.mrf.mxu0 }
 0x113   : > { %v755_v16 = vpop.f32.mrf.mxu1  ;;  %v5360_v17 = vadd.f32 %v1137_v23, %v892_v58  ;;  %v2955_v58 = vld [vmem:[%s4769_s25 + $0x75] sm:$0xff]  ;;  %v2987_v23 = vpack.c.bf16 %v2958_v47, %v2957_v42  ;;  %v470_v42 = vadd.f32 %v5171_v15, %v5231_v53  ;;  %v483_v15 = vadd.f32 %v5180_v21, %v5231_v53 }
 0x114   : > { %v896_v4 = vadd.f32 %v755_v16, %v430_v10  ;;  %v4399_v44 = vpop.f32.mrf.mxu0  ;;  %4614 = vmatmul.mubr.msk.bf16.vlgmr.msra.gmra.mxu0 %vm285_vm1, %v3380_v34  ;;  %v2986_v26 = vpack.c.bf16 %v2956_v52, %v2955_v58  ;;  %v3354_v58 = vld [vmem:[%s4769_s25 + $0x7e] sm:$0xff]  ;;  %v3356_v52 = vld [vmem:[%s4769_s25 + $0x8e] sm:$0xff]  ;;  %v475_v21 = vadd.f32 %v5231_v53, %v5189_v19 }
 0x115   : > { %v4365_v25 = vpop.f32.mrf.mxu1  ;;  %v5365_v2 = vadd.f32 %v4399_v44, %v897_v39  ;;  %4580 = vmatmul.mubr.msk.bf16.gmra.mxu1 %vm285_vm1, %v2984_v3  ;;  %4617 = vmatprep.mubr.msk.bf16.mxu0 %vm285_vm1, %v3381_v1  ;;  %v3383_v3 = vpack.c.bf16 %v3352_v35, %v3351_v43  ;;  %v446_v1 = vadd.f32 %v5231_v53, %v5280_v40  ;;  %v2961_v35 = vld [vmem:[%s4769_s25 + $0xa5] sm:$0xff] }
 0x116   : > { %v901_v32 = vadd.f32 %v4365_v25, %v451_v24  ;;  %v1150_v9 = vpop.f32.mrf.mxu0  ;;  %4583 = vmatprep.mubr.msk.bf16.mxu1 %vm285_vm1, %v2985_v46  ;;  %v3353_v25 = vld [vmem:[%s4769_s25 + $0x76] sm:$0xff] }
 0x117   : > { %v768_v39 = vpop.f32.mrf.mxu1  ;;  %v5378_v14 = vadd.f32 %v1150_v9, %v895_v18  ;;  %v3355_v9 = vld [vmem:[%s4769_s25 + $0x86] sm:$0xff] }
 0x118   : > { %v899_v60 = vadd.f32 %v768_v39, %v443_v36  ;;  %v4400_v61 = vpop.f32.mrf.mxu0  ;;  %v2960_v36 = vld [vmem:[%s4769_s25 + $0x9d] sm:$0xff]  ;;  %v2962_v39 = vld [vmem:[%s4769_s25 + $0xad] sm:$0xff] }
 0x119   : > { %v4366_v34 = vpop.f32.mrf.mxu1  ;;  %v5384_v13 = vadd.f32 %v4400_v61, %v898_v62  ;;  %v3384_v61 = vpack.c.bf16 %v3354_v58, %v3353_v25 }
 0x11a   : > { %v902_v18 = vadd.f32 %v4366_v34, %v454_v54  ;;  %v1153_v10 = vpop.f32.mrf.mxu0 }
 0x11b   : > { %v771_v46 = vpop.f32.mrf.mxu1  ;;  %v5388_v16 = vadd.f32 %v1153_v10, %v896_v4  ;;  %v2959_v4 = vld [vmem:[%s4769_s25 + $0x95] sm:$0xff]  ;;  %v2989_v10 = vpack.c.bf16 %v2962_v39, %v2961_v35  ;;  %v486_v35 = vadd.f32 %v5195_v22, %v5231_v53  ;;  %v499_v22 = vadd.f32 %v5204_v37, %v5231_v53 }
 0x11c   : > { %v900_v62 = vadd.f32 %v771_v46, %v446_v1  ;;  %v4403_v24 = vpop.f32.mrf.mxu0  ;;  %4618 = vmatmul.mubr.msk.bf16.gmra.mxu0 %vm285_vm1, %v3382_v11  ;;  %v2988_v34 = vpack.c.bf16 %v2960_v36, %v2959_v4  ;;  %v3358_v4 = vld [vmem:[%s4769_s25 + $0x9e] sm:$0xff]  ;;  %v3360_v36 = vld [vmem:[%s4769_s25 + $0xae] sm:$0xff]  ;;  %v491_v37 = vadd.f32 %v5231_v53, %v5213_v41 }
 0x11d   : > { %v4369_v44 = vpop.f32.mrf.mxu1  ;;  %v5393_v40 = vadd.f32 %v4403_v24, %v901_v32  ;;  %4584 = vmatmul.mubr.msk.bf16.gmra.mxu1 %vm285_vm1, %v2986_v26  ;;  %4621 = vmatprep.mubr.msk.bf16.mxu0 %vm285_vm1, %v3383_v3  ;;  %v3385_v26 = vpack.c.bf16 %v3356_v52, %v3355_v9  ;;  %v462_v3 = vadd.f32 %v5231_v53, %v5175_v6  ;;  %v2965_v52 = vld [vmem:[%s4769_s25 + $0xc5] sm:$0xff] }
 0x11e   : > { %v905_v30 = vadd.f32 %v4369_v44, %v467_v29  ;;  %v1166_v28 = vpop.f32.mrf.mxu0  ;;  %4587 = vmatprep.mubr.msk.bf16.mxu1 %vm285_vm1, %v2987_v23  ;;  %v3357_v44 = vld [vmem:[%s4769_s25 + $0x96] sm:$0xff] }
 0x11f   : > { %v784_v32 = vpop.f32.mrf.mxu1  ;;  %v5406_v43 = vadd.f32 %v1166_v28, %v899_v60  ;;  %v3359_v28 = vld [vmem:[%s4769_s25 + $0xa6] sm:$0xff] }
 0x120   : > { %v903_v47 = vadd.f32 %v784_v32, %v459_v7  ;;  %v4404_v54 = vpop.f32.mrf.mxu0  ;;  %v2964_v7 = vld [vmem:[%s4769_s25 + $0xbd] sm:$0xff]  ;;  %v2966_v32 = vld [vmem:[%s4769_s25 + $0xcd] sm:$0xff] }
 0x121   : > { %v4370_v11 = vpop.f32.mrf.mxu1  ;;  %v5412_v48 = vadd.f32 %v4404_v54, %v902_v18  ;;  %v3386_v54 = vpack.c.bf16 %v3358_v4, %v3357_v44 }
 0x122   : > { %v906_v60 = vadd.f32 %v4370_v11, %v470_v42  ;;  %v1169_v1 = vpop.f32.mrf.mxu0 }
 0x123   : > { %v787_v23 = vpop.f32.mrf.mxu1  ;;  %v5416_v46 = vadd.f32 %v1169_v1, %v900_v62  ;;  %v2963_v62 = vld [vmem:[%s4769_s25 + $0xb5] sm:$0xff]  ;;  %v2991_v1 = vpack.c.bf16 %v2966_v32, %v2965_v52  ;;  %v502_v52 = vadd.f32 %v5219_v45, %v5231_v53 }
 0x124   : > { %v904_v18 = vadd.f32 %v787_v23, %v462_v3  ;;  %v4407_v29 = vpop.f32.mrf.mxu0  ;;  %4622 = vmatmul.mubr.msk.bf16.gmra.mxu0 %vm285_vm1, %v3384_v61  ;;  %v2990_v11 = vpack.c.bf16 %v2964_v7, %v2963_v62  ;;  %v3362_v62 = vld [vmem:[%s4769_s25 + $0xbe] sm:$0xff]  ;;  %v3364_v7 = vld [vmem:[%s4769_s25 + $0xce] sm:$0xff] }
 0x125   : > { %v4373_v24 = vpop.f32.mrf.mxu1  ;;  %v5421_v6 = vadd.f32 %v4407_v29, %v905_v30  ;;  %4588 = vmatmul.mubr.msk.bf16.gmra.mxu1 %vm285_vm1, %v2988_v34  ;;  %4625 = vmatprep.mubr.msk.bf16.mxu0 %vm285_vm1, %v3385_v26  ;;  %v3387_v34 = vpack.c.bf16 %v3360_v36, %v3359_v28  ;;  %v478_v26 = vadd.f32 %v5231_v53, %v5199_v33  ;;  %v2969_v36 = vld [vmem:[%s4769_s25 + $0xe5] sm:$0xff] }
 0x126   : > { %v909_v25 = vadd.f32 %v4373_v24, %v483_v15  ;;  %v1182_v58 = vpop.f32.mrf.mxu0  ;;  %4591 = vmatprep.mubr.msk.bf16.mxu1 %vm285_vm1, %v2989_v10  ;;  %v3361_v24 = vld [vmem:[%s4769_s25 + $0xb6] sm:$0xff] }
 0x127   : > { %v800_v30 = vpop.f32.mrf.mxu1  ;;  %v5434_v9 = vadd.f32 %v1182_v58, %v903_v47  ;;  %v3363_v58 = vld [vmem:[%s4769_s25 + $0xc6] sm:$0xff] }
 0x128   : > { %v907_v39 = vadd.f32 %v800_v30, %v475_v21  ;;  %v4408_v42 = vpop.f32.mrf.mxu0  ;;  %v2968_v21 = vld [vmem:[%s4769_s25 + $0xdd] sm:$0xff]  ;;  %v2970_v30 = vld [vmem:[%s4769_s25 + $0xed] sm:$0xff] }
 0x129   : > { %v4374_v61 = vpop.f32.mrf.mxu1  ;;  %v5440_v19 = vadd.f32 %v4408_v42, %v906_v60  ;;  %v3388_v42 = vpack.c.bf16 %v3362_v62, %v3361_v24  ;;  %v2972_v24 = vld [vmem:[%s4769_s25 + $0xfd] sm:$0xff]  ;;  %v3367_v62 = vld [vmem:[%s4769_s25 + $0xe6] sm:$0xff] }
 0x12a   : > { %v910_v47 = vadd.f32 %v4374_v61, %v486_v35  ;;  %v1185_v3 = vpop.f32.mrf.mxu0 }
 0x12b   : > { %v803_v10 = vpop.f32.mrf.mxu1  ;;  %v5444_v23 = vadd.f32 %v1185_v3, %v904_v18  ;;  %v2967_v18 = vld [vmem:[%s4769_s25 + $0xd5] sm:$0xff]  ;;  %v2993_v3 = vpack.c.bf16 %v2970_v30, %v2969_v36 }
 0x12c   : > { %v908_v60 = vadd.f32 %v803_v10, %v478_v26  ;;  %v4411_v15 = vpop.f32.mrf.mxu0  ;;  %4626 = vmatmul.mubr.msk.bf16.gmra.mxu0 %vm285_vm1, %v3386_v54  ;;  %v2992_v61 = vpack.c.bf16 %v2968_v21, %v2967_v18 }
 0x12d   : > { %v4377_v29 = vpop.f32.mrf.mxu1  ;;  %v5449_v33 = vadd.f32 %v4411_v15, %v909_v25  ;;  %4592 = vmatmul.mubr.msk.bf16.gmra.mxu1 %vm285_vm1, %v2990_v11  ;;  %4629 = vmatprep.mubr.msk.bf16.mxu0 %vm285_vm1, %v3387_v34  ;;  %v3389_v11 = vpack.c.bf16 %v3364_v7, %v3363_v58  ;;  %v2974_v58 = vld [vmem:[%s4769_s25 + $0x10d] sm:$0xff] }
 0x12e   : > { %v913_v44 = vadd.f32 %v4377_v29, %v499_v22  ;;  %v1198_v4 = vpop.f32.mrf.mxu0  ;;  %4595 = vmatprep.mubr.msk.bf16.mxu1 %vm285_vm1, %v2991_v1  ;;  %v3366_v29 = vld [vmem:[%s4769_s25 + $0xde] sm:$0xff] }
 0x12f   : > { %v816_v25 = vpop.f32.mrf.mxu1  ;;  %v5462_v28 = vadd.f32 %v1198_v4, %v907_v39  ;;  %v494_v39 = vadd.f32 %v5231_v53, %v5223_v51  ;;  %v2971_v51 = vld [vmem:[%s4769_s25 + $0xf5] sm:$0xff] }
 0x130   : > { %v911_v32 = vadd.f32 %v816_v25, %v491_v37  ;;  %v4412_v35 = vpop.f32.mrf.mxu0  ;;  %v3365_v53 = vld [vmem:[%s4769_s25 + $0xd6] sm:$0xff]  ;;  %v3368_v37 = vld [vmem:[%s4769_s25 + $0xee] sm:$0xff] }
 0x131   : > { %v4378_v54 = vpop.f32.mrf.mxu1  ;;  %v5468_v41 = vadd.f32 %v4412_v35, %v910_v47  ;;  %v3390_v36 = vpack.c.bf16 %v3366_v29, %v3365_v53  ;;  %v3391_v35 = vpack.c.bf16 %v3368_v37, %v3367_v62 }
 0x132   : > { %v914_v34 = vadd.f32 %v4378_v54, %v502_v52  ;;  %v1201_v26 = vpop.f32.mrf.mxu0 }
 0x133   : > { %v819_v1 = vpop.f32.mrf.mxu1  ;;  %v5472_v45 = vadd.f32 %v1201_v26, %v908_v60 }
 0x134   : > { %v912_v10 = vadd.f32 %v819_v1, %v494_v39  ;;  %v4415_v47 = vpop.f32.mrf.mxu0  ;;  %4630 = vmatmul.mubr.msk.bf16.gmra.mxu0 %vm285_vm1, %v3388_v42  ;;  %v3370_v1 = vld [vmem:[%s4769_s25 + $0xfe] sm:$0xff] }
 0x135   : > { %v4381_v22 = vpop.f32.mrf.mxu1  ;;  %v5475_v15 = vadd.f32 %v4415_v47, %v913_v44  ;;  %4596 = vmatmul.mubr.msk.bf16.gmra.mxu1 %vm285_vm1, %v2992_v61  ;;  %4633 = vmatprep.mubr.msk.bf16.mxu0 %vm285_vm1, %v3389_v11  ;;  %v2973_v44 = vld [vmem:[%s4769_s25 + $0x105] sm:$0xff] }
 0x136   : > { %v917_v60 = vadd.f32 %v4381_v22, %v5236_v55  ;;  %v1214_v18 = vpop.f32.mrf.mxu0  ;;  %4599 = vmatprep.mubr.msk.bf16.mxu1 %vm285_vm1, %v2993_v3  ;;  %v2994_v55 = vpack.c.bf16 %v2972_v24, %v2971_v51  ;;  %v2995_v61 = vpack.c.bf16 %v2974_v58, %v2973_v44  ;;  %v3369_v3 = vld [vmem:[%s4769_s25 + $0xf6] sm:$0xff]  ;;  %v3371_v22 = vld [vmem:[%s4769_s25 + $0x106] sm:$0xff]  ;;  %v3372_v51 = vld [vmem:[%s4769_s25 + $0x10e] sm:$0xff] }
 0x137   : > { %v832_v4 = vpop.f32.mrf.mxu1  ;;  %v5487_v21 = vadd.f32 %v1214_v18, %v911_v32  ;;  %v2978_v18 = vld [vmem:[%s4769_s25 + $0x12d] sm:$0xff]  ;;  %v3392_v37 = vpack.c.bf16 %v3370_v1, %v3369_v3  ;;  %v3393_v58 = vpack.c.bf16 %v3372_v51, %v3371_v22 }
 0x138   : > { %v915_v7 = vadd.f32 %v832_v4, %v5246_v63  ;;  %v4416_v25 = vpop.f32.mrf.mxu0 }
 0x139   : > { %v4382_v30 = vpop.f32.mrf.mxu1  ;;  %v5492_v52 = vadd.f32 %v4416_v25, %v914_v34 }
 0x13a   : > { %v918_v42 = vadd.f32 %v4382_v30, %v5251_v59  ;;  %v1217_v54 = vpop.f32.mrf.mxu0  ;;  %v2975_v59 = vld [vmem:[%s4769_s25 + $0x115] sm:$0xff] }
 0x13b   : > { %v835_v32 = vpop.f32.mrf.mxu1  ;;  %v5495_v11 = vadd.f32 %v1217_v54, %v912_v10 }
 0x13c   : > { %v916_v63 = vadd.f32 %v835_v32, %v5258_v5  ;;  %v4419_v39 = vpop.f32.mrf.mxu0  ;;  %4634 = vmatmul.mubr.msk.bf16.gmra.mxu0 %vm285_vm1, %v3390_v36  ;;  %v2976_v5 = vld [vmem:[%s4769_s25 + $0x11d] sm:$0xff] }
 0x13d   : > { %v5499_v34 = vadd.f32 %v4419_v39, %v917_v60  ;;  %v4425_v26 = vpop.f32.mrf.mxu1  ;;  %4600 = vmatmul.mubr.msk.bf16.gmra.mxu1 %vm285_vm1, %v2994_v55  ;;  %4637 = vmatprep.mubr.msk.bf16.mxu0 %vm285_vm1, %v3391_v35  ;;  %v2977_v60 = vld [vmem:[%s4769_s25 + $0x125] sm:$0xff] }
 0x13e   : > { %v1681_v10 = vadd.f32 %v4425_v26, %v5285_v57  ;;  %v1230_v47 = vpop.f32.mrf.mxu0  ;;  %4603 = vmatprep.mubr.msk.bf16.mxu1 %vm285_vm1, %v2995_v61  ;;  %v2996_v57 = vpack.c.bf16 %v2976_v5, %v2975_v59  ;;  %v3373_v61 = vld [vmem:[%s4769_s25 + $0x116] sm:$0xff]  ;;  %v3374_v32 = vld [vmem:[%s4769_s25 + $0x11e] sm:$0xff]  ;;  %v3376_v59 = vld [vmem:[%s4769_s25 + $0x12e] sm:$0xff] }
 0x13f   : > { %v5511_v53 = vadd.f32 %v1230_v47, %v915_v7  ;;  %v1500_v29 = vpop.f32.mrf.mxu1  ;;  %v2997_v7 = vpack.c.bf16 %v2978_v18, %v2977_v60  ;;  %v2980_v26 = vld [vmem:[%s4769_s25 + $0x13d] sm:$0xff]  ;;  %v3394_v5 = vpack.c.bf16 %v3374_v32, %v3373_v61 }
 0x140   : > { %v1679_v24 = vadd.f32 %v1500_v29, %v5294_v0  ;;  %v4420_v62 = vpop.f32.mrf.mxu0 }
 0x141   : > { %v5516_v4 = vadd.f32 %v4420_v62, %v918_v42  ;;  %v4426_v44 = vpop.f32.mrf.mxu1 }
 0x142   : > { %v1682_v25 = vadd.f32 %v4426_v44, %v5300_v12  ;;  %v1233_v36 = vpop.f32.mrf.mxu0  ;;  %v2979_v12 = vld [vmem:[%s4769_s25 + $0x135] sm:$0xff] }
 0x143   : > { %v5519_v30 = vadd.f32 %v1233_v36, %v916_v63  ;;  %v1503_v55 = vpop.f32.mrf.mxu1  ;;  %v2998_v29 = vpack.c.bf16 %v2980_v26, %v2979_v12 }
 0x144   : > { %v1680_v0 = vadd.f32 %v1503_v55, %v5304_v27  ;;  %v4463_v35 = vpop.f32.mrf.mxu0  ;;  %4638 = vmatmul.mubr.msk.bf16.gmra.mxu0 %vm285_vm1, %v3392_v37  ;;  %v3375_v27 = vld [vmem:[%s4769_s25 + $0x126] sm:$0xff] }
 0x145   : > { %v4429_v42 = vpop.f32.mrf.mxu1  ;;  %v5523_v54 = vadd.f32 %v4463_v35, %v1681_v10  ;;  %4604 = vmatmul.mubr.msk.bf16.gmra.mxu1 %vm285_vm1, %v2996_v57  ;;  %4641 = vmatprep.mubr.msk.bf16.mxu0 %vm285_vm1, %v3393_v58  ;;  %v3377_v58 = vld [vmem:[%s4769_s25 + $0x136] sm:$0xff] }
 0x146   : > { %v1685_v63 = vadd.f32 %v4429_v42, %v5309_v31  ;;  %v1898_v39 = vpop.f32.mrf.mxu0  ;;  %4607 = vmatprep.mubr.msk.bf16.mxu1 %vm285_vm1, %v2997_v7  ;;  %v3395_v31 = vpack.c.bf16 %v3376_v59, %v3375_v27 }
 0x147   : > { %v1516_v3 = vpop.f32.mrf.mxu1  ;;  %v5535_v1 = vadd.f32 %v1898_v39, %v1679_v24 }
 0x148   : > { %v1683_v10 = vadd.f32 %v1516_v3, %v5322_v20  ;;  %v4464_v47 = vpop.f32.mrf.mxu0 }
 0x149   : > { %v4430_v22 = vpop.f32.mrf.mxu1  ;;  %v5538_v51 = vadd.f32 %v4464_v47, %v1682_v25  ;;  %v3378_v25 = vld [vmem:[%s4769_s25 + $0x13e] sm:$0xff] }
 0x14a   : > { %v1686_v60 = vadd.f32 %v4430_v22, %v5328_v38  ;;  %v1901_v18 = vpop.f32.mrf.mxu0  ;;  %v3396_v35 = vpack.c.bf16 %v3378_v25, %v3377_v58 }
 0x14b   : > { %v1519_v62 = vpop.f32.mrf.mxu1  ;;  %v5541_v37 = vadd.f32 %v1901_v18, %v1680_v0 }
 0x14c   : > { %v1684_v24 = vadd.f32 %v1519_v62, %v5332_v8  ;;  %v4467_v44 = vpop.f32.mrf.mxu0  ;;  %4642 = vmatmul.mubr.msk.bf16.gmra.mxu0 %vm285_vm1, %v3394_v5 }
 0x14d   : > { %v4433_v20 = vpop.f32.mrf.mxu1  ;;  %v5545_v57 = vadd.f32 %v4467_v44, %v1685_v63  ;;  %4608 = vmatmul.mubr.msk.bf16.gmra.mxu1 %vm285_vm1, %v2998_v29  ;;  %4645 = vmatprep.mubr.msk.bf16.mxu0 %vm285_vm1, %v3395_v31 }
 0x14e   : > { %v1689_v38 = vadd.f32 %v4433_v20, %v5337_v49  ;;  %v1914_v36 = vpop.f32.mrf.mxu0 }
 0x14f   : > { %v1532_v7 = vpop.f32.mrf.mxu1  ;;  %v5552_v55 = vadd.f32 %v1914_v36, %v1683_v10 }
 0x150   : > { %v1687_v8 = vadd.f32 %v1532_v7, %v5350_v50  ;;  %v4468_v0 = vpop.f32.mrf.mxu0 }
 0x151   : > { %v4434_v42 = vpop.f32.mrf.mxu1  ;;  %v5555_v12 = vadd.f32 %v4468_v0, %v1686_v60 }
 0x152   : > { %v1690_v61 = vadd.f32 %v4434_v42, %v5356_v56  ;;  %v1917_v32 = vpop.f32.mrf.mxu0 }
 0x153   : > { %v1535_v63 = vpop.f32.mrf.mxu1  ;;  %v5558_v39 = vadd.f32 %v1917_v32, %v1684_v24 }
 0x154   : > { %v1688_v26 = vadd.f32 %v1535_v63, %v5360_v17  ;;  %v4471_v49 = vpop.f32.mrf.mxu0  ;;  %4646 = vmatmul.mubr.msk.bf16.gmra.mxu0 %vm285_vm1, %v3396_v35 }
 0x155   : > { %v4437_v27 = vpop.f32.mrf.mxu1  ;;  %v5562_v59 = vadd.f32 %v4471_v49, %v1689_v38 }
 0x156   : > { %v1693_v50 = vadd.f32 %v4437_v27, %v5365_v2  ;;  %v1930_v3 = vpop.f32.mrf.mxu0 }
 0x157   : > { %v1548_v10 = vpop.f32.mrf.mxu1  ;;  %v5565_v47 = vadd.f32 %v1930_v3, %v1687_v8 }
 0x158   : > { %v1691_v56 = vadd.f32 %v1548_v10, %v5378_v14  ;;  %v4472_v5 = vpop.f32.mrf.mxu0 }
 0x159   : > { %v4438_v22 = vpop.f32.mrf.mxu1  ;;  %v5568_v29 = vadd.f32 %v4472_v5, %v1690_v61 }
 0x15a   : > { %v1694_v17 = vadd.f32 %v4438_v22, %v5384_v13  ;;  %v1933_v31 = vpop.f32.mrf.mxu0 }
 0x15b   : > { %v1551_v60 = vpop.f32.mrf.mxu1  ;;  %v5571_v18 = vadd.f32 %v1933_v31, %v1688_v26 }
 0x15c   : > { %v1692_v62 = vadd.f32 %v1551_v60, %v5388_v16  ;;  %v4475_v24 = vpop.f32.mrf.mxu0 }
 0x15d   : > { %v4441_v2 = vpop.f32.mrf.mxu1  ;;  %v5574_v44 = vadd.f32 %v4475_v24, %v1693_v50 }
 0x15e   : > { %v1697_v20 = vadd.f32 %v4441_v2, %v5393_v40  ;;  %v1946_v58 = vpop.f32.mrf.mxu0 }
 0x15f   : > { %v1564_v14 = vpop.f32.mrf.mxu1  ;;  %v5577_v25 = vadd.f32 %v1946_v58, %v1691_v56 }
 0x160   : > { %v1695_v38 = vadd.f32 %v1564_v14, %v5406_v43  ;;  %v4476_v36 = vpop.f32.mrf.mxu0 }
 0x161   : > { %v4442_v13 = vpop.f32.mrf.mxu1  ;;  %v5580_v7 = vadd.f32 %v4476_v36, %v1694_v17 }
 0x162   : > { %v1698_v8 = vadd.f32 %v4442_v13, %v5412_v48  ;;  %v1949_v0 = vpop.f32.mrf.mxu0 }
 0x163   : > { %v1567_v16 = vpop.f32.mrf.mxu1  ;;  %v5583_v35 = vadd.f32 %v1949_v0, %v1692_v62 }
 0x164   : > { %v1696_v42 = vadd.f32 %v1567_v16, %v5416_v46  ;;  %v4479_v61 = vpop.f32.mrf.mxu0 }
 0x165   : > { %v4445_v40 = vpop.f32.mrf.mxu1  ;;  %v5586_v32 = vadd.f32 %v4479_v61, %v1697_v20 }
 0x166   : > { %v1701_v63 = vadd.f32 %v4445_v40, %v5421_v6  ;;  %v1962_v26 = vpop.f32.mrf.mxu0 }
 0x167   : > { %v1580_v43 = vpop.f32.mrf.mxu1  ;;  %v5589_v49 = vadd.f32 %v1962_v26, %v1695_v38 }
 0x168   : > { %v1699_v27 = vadd.f32 %v1580_v43, %v5434_v9  ;;  %v4480_v50 = vpop.f32.mrf.mxu0 }
 0x169   : > { %v4446_v48 = vpop.f32.mrf.mxu1  ;;  %v5592_v3 = vadd.f32 %v4480_v50, %v1698_v8 }
 0x16a   : > { %v1702_v10 = vadd.f32 %v4446_v48, %v5440_v19  ;;  %v1965_v56 = vpop.f32.mrf.mxu0 }
 0x16b   : > { %v1583_v46 = vpop.f32.mrf.mxu1  ;;  %v5595_v5 = vadd.f32 %v1965_v56, %v1696_v42 }
 0x16c   : > { %v1700_v22 = vadd.f32 %v1583_v46, %v5444_v23  ;;  %v4483_v17 = vpop.f32.mrf.mxu0 }
 0x16d   : > { %v4449_v6 = vpop.f32.mrf.mxu1  ;;  %v5598_v31 = vadd.f32 %v4483_v17, %v1701_v63 }
 0x16e   : > { %v1705_v60 = vadd.f32 %v4449_v6, %v5449_v33  ;;  %v1978_v62 = vpop.f32.mrf.mxu0 }
 0x16f   : > { %v1596_v9 = vpop.f32.mrf.mxu1  ;;  %v5601_v24 = vadd.f32 %v1978_v62, %v1699_v27 }
 0x170   : > { %v1703_v2 = vadd.f32 %v1596_v9, %v5462_v28  ;;  %v4484_v20 = vpop.f32.mrf.mxu0 }
 0x171   : > { %v4450_v19 = vpop.f32.mrf.mxu1  ;;  %v5604_v58 = vadd.f32 %v4484_v20, %v1702_v10 }
 0x172   : > { %v1706_v14 = vadd.f32 %v4450_v19, %v5468_v41  ;;  %v1981_v38 = vpop.f32.mrf.mxu0 }
 0x173   : > { %v1599_v23 = vpop.f32.mrf.mxu1  ;;  %v5607_v36 = vadd.f32 %v1981_v38, %v1700_v22 }
 0x174   : > { %v1704_v13 = vadd.f32 %v1599_v23, %v5472_v45  ;;  %v4487_v8 = vpop.f32.mrf.mxu0 }
 0x175   : > { %v4453_v33 = vpop.f32.mrf.mxu1  ;;  %v5610_v0 = vadd.f32 %v4487_v8, %v1705_v60 }
 0x176   : > { %v1709_v16 = vadd.f32 %v4453_v33, %v5475_v15  ;;  %v1994_v42 = vpop.f32.mrf.mxu0 }
 0x177   : > { %v1612_v28 = vpop.f32.mrf.mxu1  ;;  %v5613_v61 = vadd.f32 %v1994_v42, %v1703_v2 }
 0x178   : > { %v1707_v40 = vadd.f32 %v1612_v28, %v5487_v21  ;;  %v4488_v63 = vpop.f32.mrf.mxu0 }
 0x179   : > { %v4454_v41 = vpop.f32.mrf.mxu1  ;;  %v5616_v26 = vadd.f32 %v4488_v63, %v1706_v14 }
 0x17a   : > { %v1710_v43 = vadd.f32 %v4454_v41, %v5492_v52  ;;  %v1997_v27 = vpop.f32.mrf.mxu0 }
 0x17b   : > { %v1615_v45 = vpop.f32.mrf.mxu1  ;;  %v5619_v50 = vadd.f32 %v1997_v27, %v1704_v13 }
 0x17c   : > { %v1708_v48 = vadd.f32 %v1615_v45, %v5495_v11  ;;  %v4491_v10 = vpop.f32.mrf.mxu0 }
 0x17d   : > { %v4457_v15 = vpop.f32.mrf.mxu1  ;;  %v5622_v56 = vadd.f32 %v4491_v10, %v1709_v16 }
 0x17e   : > { %v1713_v46 = vadd.f32 %v4457_v15, %v5499_v34  ;;  %v2010_v22 = vpop.f32.mrf.mxu0 }
 0x17f   : > { %v1628_v21 = vpop.f32.mrf.mxu1  ;;  %v5625_v17 = vadd.f32 %v2010_v22, %v1707_v40 }
 0x180   : > { %v1711_v6 = vadd.f32 %v1628_v21, %v5511_v53  ;;  %v4492_v60 = vpop.f32.mrf.mxu0 }
 0x181   : > { %v4458_v52 = vpop.f32.mrf.mxu1  ;;  %v5628_v62 = vadd.f32 %v4492_v60, %v1710_v43 }
 0x182   : > { %v1714_v9 = vadd.f32 %v4458_v52, %v5516_v4  ;;  %v2013_v2 = vpop.f32.mrf.mxu0 }
 0x183   : > { %v1631_v11 = vpop.f32.mrf.mxu1  ;;  %v5631_v20 = vadd.f32 %v2013_v2, %v1708_v48 }
 0x184   : > { %v1712_v19 = vadd.f32 %v1631_v11, %v5519_v30  ;;  %v4495_v14 = vpop.f32.mrf.mxu0 }
 0x185   : > { %v5634_v34 = vadd.f32 %v4495_v14, %v1713_v46  ;;  %v4501_v38 = vpop.f32.mrf.mxu1 }
 0x186   : > { %v2477_v23 = vadd.f32 %v4501_v38, %v5523_v54  ;;  %v2026_v13 = vpop.f32.mrf.mxu0 }
 0x187   : > { %v5637_v53 = vadd.f32 %v2026_v13, %v1711_v6  ;;  %v2296_v8 = vpop.f32.mrf.mxu1 }
 0x188   : > { %v2475_v33 = vadd.f32 %v2296_v8, %v5535_v1  ;;  %v4496_v16 = vpop.f32.mrf.mxu0 }
 0x189   : > { %v5640_v4 = vadd.f32 %v4496_v16, %v1714_v9  ;;  %v4502_v42 = vpop.f32.mrf.mxu1 }
 0x18a   : > { %v2478_v28 = vadd.f32 %v4502_v42, %v5538_v51  ;;  %v2029_v40 = vpop.f32.mrf.mxu0 }
 0x18b   : > { %v5643_v30 = vadd.f32 %v2029_v40, %v1712_v19  ;;  %v2299_v63 = vpop.f32.mrf.mxu1 }
 0x18c   : > { %v2476_v41 = vadd.f32 %v2299_v63, %v5541_v37  ;;  %v4539_v43 = vpop.f32.mrf.mxu0 }
 0x18d   : > { %v4505_v54 = vpop.f32.mrf.mxu1  ;;  %v5646_v27 = vadd.f32 %v4539_v43, %v2477_v23 }
 0x18e   : > { %v2481_v45 = vadd.f32 %v4505_v54, %v5545_v57  ;;  %v2694_v48 = vpop.f32.mrf.mxu0 }
 0x18f   : > { %v2312_v1 = vpop.f32.mrf.mxu1  ;;  %v5649_v10 = vadd.f32 %v2694_v48, %v2475_v33 }
 0x190   : > { %v2479_v15 = vadd.f32 %v2312_v1, %v5552_v55  ;;  %v4540_v46 = vpop.f32.mrf.mxu0 }
 0x191   : > { %v4506_v51 = vpop.f32.mrf.mxu1  ;;  %v5652_v22 = vadd.f32 %v4540_v46, %v2478_v28 }
 0x192   : > { %v2482_v21 = vadd.f32 %v4506_v51, %v5555_v12  ;;  %v2697_v6 = vpop.f32.mrf.mxu0 }
 0x193   : > { %v2315_v37 = vpop.f32.mrf.mxu1  ;;  %v5655_v60 = vadd.f32 %v2697_v6, %v2476_v41 }
 0x194   : > { %v2480_v52 = vadd.f32 %v2315_v37, %v5558_v39  ;;  %v4543_v9 = vpop.f32.mrf.mxu0 }
 0x195   : > { %v4509_v57 = vpop.f32.mrf.mxu1  ;;  %v5658_v2 = vadd.f32 %v4543_v9, %v2481_v45 }
 0x196   : > { %v2485_v11 = vadd.f32 %v4509_v57, %v5562_v59  ;;  %v2710_v19 = vpop.f32.mrf.mxu0 }
 0x197   : > { %v2328_v55 = vpop.f32.mrf.mxu1  ;;  %v5661_v14 = vadd.f32 %v2710_v19, %v2479_v15 }
 0x198   : > { %v2483_v38 = vadd.f32 %v2328_v55, %v5565_v47  ;;  %v4544_v23 = vpop.f32.mrf.mxu0 }
 0x199   : > { %v4510_v12 = vpop.f32.mrf.mxu1  ;;  %v5664_v13 = vadd.f32 %v4544_v23, %v2482_v21 }
 0x19a   : > { %v2486_v8 = vadd.f32 %v4510_v12, %v5568_v29  ;;  %v2713_v33 = vpop.f32.mrf.mxu0 }
 0x19b   : > { %v2331_v39 = vpop.f32.mrf.mxu1  ;;  %v5667_v16 = vadd.f32 %v2713_v33, %v2480_v52 }
 0x19c   : > { %v2484_v42 = vadd.f32 %v2331_v39, %v5571_v18  ;;  %v4547_v28 = vpop.f32.mrf.mxu0 }
 0x19d   : > { %v4513_v59 = vpop.f32.mrf.mxu1  ;;  %v5670_v40 = vadd.f32 %v4547_v28, %v2485_v11 }
 0x19e   : > { %v2489_v63 = vadd.f32 %v4513_v59, %v5574_v44  ;;  %v2726_v41 = vpop.f32.mrf.mxu0 }
 0x19f   : > { %v2344_v47 = vpop.f32.mrf.mxu1  ;;  %v5673_v43 = vadd.f32 %v2726_v41, %v2483_v38 }
 0x1a0   : > { %v2487_v54 = vadd.f32 %v2344_v47, %v5577_v25  ;;  %v4548_v45 = vpop.f32.mrf.mxu0 }
 0x1a1   : > { %v4514_v29 = vpop.f32.mrf.mxu1  ;;  %v5676_v48 = vadd.f32 %v4548_v45, %v2486_v8 }
 0x1a2   : > { %v2490_v1 = vadd.f32 %v4514_v29, %v5580_v7  ;;  %v2729_v15 = vpop.f32.mrf.mxu0 }
 0x1a3   : > { %v2347_v18 = vpop.f32.mrf.mxu1  ;;  %v5679_v46 = vadd.f32 %v2729_v15, %v2484_v42 }
 0x1a4   : > { %v2488_v51 = vadd.f32 %v2347_v18, %v5583_v35  ;;  %v4551_v21 = vpop.f32.mrf.mxu0 }
 0x1a5   : > { %v4517_v44 = vpop.f32.mrf.mxu1  ;;  %v5682_v6 = vadd.f32 %v4551_v21, %v2489_v63 }
 0x1a6   : > { %v2493_v37 = vadd.f32 %v4517_v44, %v5586_v32  ;;  %v2742_v52 = vpop.f32.mrf.mxu0 }
 0x1a7   : > { %v2360_v25 = vpop.f32.mrf.mxu1  ;;  %v5685_v9 = vadd.f32 %v2742_v52, %v2487_v54 }
 0x1a8   : > { %v2491_v57 = vadd.f32 %v2360_v25, %v5589_v49  ;;  %v4552_v11 = vpop.f32.mrf.mxu0 }
 0x1a9   : > { %v4518_v7 = vpop.f32.mrf.mxu1  ;;  %v5688_v19 = vadd.f32 %v4552_v11, %v2490_v1 }
 0x1aa   : > { %v2494_v55 = vadd.f32 %v4518_v7, %v5592_v3  ;;  %v2745_v38 = vpop.f32.mrf.mxu0 }
 0x1ab   : > { %v2363_v35 = vpop.f32.mrf.mxu1  ;;  %v5691_v23 = vadd.f32 %v2745_v38, %v2488_v51 }
 0x1ac   : > { %v2492_v12 = vadd.f32 %v2363_v35, %v5595_v5  ;;  %v4555_v8 = vpop.f32.mrf.mxu0 }
 0x1ad   : > { %v4521_v32 = vpop.f32.mrf.mxu1  ;;  %v5694_v33 = vadd.f32 %v4555_v8, %v2493_v37 }
 0x1ae   : > { %v2497_v39 = vadd.f32 %v4521_v32, %v5598_v31  ;;  %v2758_v42 = vpop.f32.mrf.mxu0 }
 0x1af   : > { %v2376_v49 = vpop.f32.mrf.mxu1  ;;  %v5697_v28 = vadd.f32 %v2758_v42, %v2491_v57 }
 0x1b0   : > { %v2495_v59 = vadd.f32 %v2376_v49, %v5601_v24  ;;  %v4556_v63 = vpop.f32.mrf.mxu0 }
 0x1b1   : > { %v4522_v3 = vpop.f32.mrf.mxu1  ;;  %v5700_v41 = vadd.f32 %v4556_v63, %v2494_v55 }
 0x1b2   : > { %v2498_v47 = vadd.f32 %v4522_v3, %v5604_v58  ;;  %v2761_v54 = vpop.f32.mrf.mxu0 }
 0x1b3   : > { %v2379_v5 = vpop.f32.mrf.mxu1  ;;  %v5703_v45 = vadd.f32 %v2761_v54, %v2492_v12 }
 0x1b4   : > { %v2496_v29 = vadd.f32 %v2379_v5, %v5607_v36  ;;  %v4559_v1 = vpop.f32.mrf.mxu0 }
 0x1b5   : > { %v4525_v31 = vpop.f32.mrf.mxu1  ;;  %v5706_v15 = vadd.f32 %v4559_v1, %v2497_v39 }
 0x1b6   : > { %v2501_v18 = vadd.f32 %v4525_v31, %v5610_v0  ;;  %v2774_v51 = vpop.f32.mrf.mxu0 }
 0x1b7   : > { %v2392_v24 = vpop.f32.mrf.mxu1  ;;  %v5709_v21 = vadd.f32 %v2774_v51, %v2495_v59 }
 0x1b8   : > { %v2499_v44 = vadd.f32 %v2392_v24, %v5613_v61  ;;  %v4560_v37 = vpop.f32.mrf.mxu0 }
 0x1b9   : > { %v4526_v58 = vpop.f32.mrf.mxu1  ;;  %v5712_v52 = vadd.f32 %v4560_v37, %v2498_v47 }
 0x1ba   : > { %v2502_v25 = vadd.f32 %v4526_v58, %v5616_v26  ;;  %v2777_v57 = vpop.f32.mrf.mxu0 }
 0x1bb   : > { %v2395_v36 = vpop.f32.mrf.mxu1  ;;  %v5715_v11 = vadd.f32 %v2777_v57, %v2496_v29 }
 0x1bc   : > { %v2500_v7 = vadd.f32 %v2395_v36, %v5619_v50  ;;  %v4563_v55 = vpop.f32.mrf.mxu0 }
 0x1bd   : > { %v4529_v0 = vpop.f32.mrf.mxu1  ;;  %v5718_v38 = vadd.f32 %v4563_v55, %v2501_v18 }
 0x1be   : > { %v2505_v35 = vadd.f32 %v4529_v0, %v5622_v56  ;;  %v2790_v12 = vpop.f32.mrf.mxu0 }
 0x1bf   : > { %v2408_v61 = vpop.f32.mrf.mxu1  ;;  %v5721_v8 = vadd.f32 %v2790_v12, %v2499_v44 }
 0x1c0   : > { %v2503_v32 = vadd.f32 %v2408_v61, %v5625_v17  ;;  %v4564_v39 = vpop.f32.mrf.mxu0 }
 0x1c1   : > { %v4530_v26 = vpop.f32.mrf.mxu1  ;;  %v5724_v42 = vadd.f32 %v4564_v39, %v2502_v25 }
 0x1c2   : > { %v2506_v49 = vadd.f32 %v4530_v26, %v5628_v62  ;;  %v2793_v59 = vpop.f32.mrf.mxu0 }
 0x1c3   : > { %v2411_v50 = vpop.f32.mrf.mxu1  ;;  %v5727_v63 = vadd.f32 %v2793_v59, %v2500_v7 }
 0x1c4   : > { %v2504_v3 = vadd.f32 %v2411_v50, %v5631_v20  ;;  %v4567_v47 = vpop.f32.mrf.mxu0 }
 0x1c5   : > { %v4533_v56 = vpop.f32.mrf.mxu1  ;;  %v5730_v54 = vadd.f32 %v4567_v47, %v2505_v35 }
 0x1c6   : > { %v2509_v5 = vadd.f32 %v4533_v56, %v5634_v34  ;;  %v2806_v29 = vpop.f32.mrf.mxu0 }
 0x1c7   : > { %v2424_v17 = vpop.f32.mrf.mxu1  ;;  %v5733_v1 = vadd.f32 %v2806_v29, %v2503_v32 }
 0x1c8   : > { %v2507_v31 = vadd.f32 %v2424_v17, %v5637_v53  ;;  %v4568_v18 = vpop.f32.mrf.mxu0 }
 0x1c9   : > { %v4534_v62 = vpop.f32.mrf.mxu1  ;;  %v5736_v51 = vadd.f32 %v4568_v18, %v2506_v49 }
 0x1ca   : > { %v2510_v24 = vadd.f32 %v4534_v62, %v5640_v4  ;;  %v2809_v20 = vpop.f32.mrf.mxu0 }
 0x1cb   : > { %v2427_v44 = vpop.f32.mrf.mxu1  ;;  %v5739_v37 = vadd.f32 %v2809_v20, %v2504_v3 }
 0x1cc   : > { %v2508_v58 = vadd.f32 %v2427_v44, %v5643_v30  ;;  %v4571_v34 = vpop.f32.mrf.mxu0 }
 0x1cd   : > { %v5742_v25 = vadd.f32 %v4571_v34, %v2509_v5  ;;  %v4577_v57 = vpop.f32.mrf.mxu1 }
 0x1ce   : > { %v2822_v36 = vpop.f32.mrf.mxu0  ;;  %v3273_v12 = vadd.f32 %v4577_v57, %v5646_v27 }
 0x1cf   : > { %v5744_v7 = vadd.f32 %v2822_v36, %v2507_v31  ;;  %v3092_v53 = vpop.f32.mrf.mxu1 }
 0x1d0   : > { %v4572_v55 = vpop.f32.mrf.mxu0  ;;  %v3271_v39 = vadd.f32 %v3092_v53, %v5649_v10 }
 0x1d1   : > { %v5746_v0 = vadd.f32 %v4572_v55, %v2510_v24  ;;  %v4578_v35 = vpop.f32.mrf.mxu1 }
 0x1d2   : > { %v2825_v4 = vpop.f32.mrf.mxu0  ;;  %v3274_v50 = vadd.f32 %v4578_v35, %v5652_v22 }
 0x1d3   : > { %v5750_v61 = vadd.f32 %v2825_v4, %v2508_v58  ;;  %v3095_v32 = vpop.f32.mrf.mxu1 }
 0x1d4   : > { %v4615_v30 = vpop.f32.mrf.mxu0  ;;  %v3272_v5 = vadd.f32 %v3095_v32, %v5655_v60 }
 0x1d5   : > { %v4581_v26 = vpop.f32.mrf.mxu1  ;;  %v3671_v49 = vadd.f32 %v4615_v30, %v3273_v12 }
 0x1d6   : > { %v3490_v59 = vpop.f32.mrf.mxu0  ;;  %v3277_v18 = vadd.f32 %v4581_v26, %v5658_v2 }
 0x1d7   : > { %v3779_v3 = vmax.f32 %v3671_v49, 0.0  ;;  %v3108_v27 = vpop.f32.mrf.mxu1  ;;  %v3669_v47 = vadd.f32 %v3490_v59, %v3271_v39 }
 0x1d8   : > { %v4616_v56 = vpop.f32.mrf.mxu0  ;;  %v3275_v44 = vadd.f32 %v3108_v27, %v5661_v14 }
 0x1d9   : > { %3815 = vst [vmem:[%s5756_s20 + $0x10] sm:$0xff] %v3779_v3  ;;  %v3777_v10 = vmax.f32 %v3669_v47, 0.0  ;;  %v4582_v29 = vpop.f32.mrf.mxu1  ;;  %v3672_v17 = vadd.f32 %v4616_v56, %v3274_v50 }
 0x1da   : > { %v3493_v31 = vpop.f32.mrf.mxu0  ;;  %v3278_v36 = vadd.f32 %v4582_v29, %v5664_v13 }
 0x1db   : > { %3813 = vst [vmem:[%s5756_s20] sm:$0xff] %v3777_v10  ;;  %v3780_v62 = vmax.f32 %v3672_v17, 0.0  ;;  %v3111_v24 = vpop.f32.mrf.mxu1  ;;  %v3670_v22 = vadd.f32 %v3493_v31, %v3272_v5 }
 0x1dc   : > { %v4619_v20 = vpop.f32.mrf.mxu0  ;;  %v3276_v4 = vadd.f32 %v3111_v24, %v5667_v16 }
 0x1dd   : > { %3816 = vst [vmem:[%s5756_s20 + $0x18] sm:$0xff] %v3780_v62  ;;  %v3778_v58 = vmax.f32 %v3670_v22, 0.0  ;;  %v4585_v34 = vpop.f32.mrf.mxu1  ;;  %v3675_v60 = vadd.f32 %v4619_v20, %v3277_v18 }
 0x1de   : > { %v3506_v57 = vpop.f32.mrf.mxu0  ;;  %v3281_v39 = vadd.f32 %v4585_v34, %v5670_v40 }
 0x1df   : > { %3814 = vst [vmem:[%s5756_s20 + $0x8] sm:$0xff] %v3778_v58  ;;  %v3783_v53 = vmax.f32 %v3675_v60, 0.0  ;;  %v3124_v55 = vpop.f32.mrf.mxu1  ;;  %v3673_v2 = vadd.f32 %v3506_v57, %v3275_v44 }
 0x1e0   : > { %v4620_v35 = vpop.f32.mrf.mxu0  ;;  %v3279_v50 = vadd.f32 %v3124_v55, %v5673_v43 }
 0x1e1   : > { %3819 = vst [vmem:[%s5756_s20 + $0x30] sm:$0xff] %v3783_v53  ;;  %v3781_v12 = vmax.f32 %v3673_v2, 0.0  ;;  %v4586_v32 = vpop.f32.mrf.mxu1  ;;  %v3676_v14 = vadd.f32 %v4620_v35, %v3278_v36 }
 0x1e2   : > { %v3509_v30 = vpop.f32.mrf.mxu0  ;;  %v3282_v56 = vadd.f32 %v4586_v32, %v5676_v48 }
 0x1e3   : > { %3817 = vst [vmem:[%s5756_s20 + $0x20] sm:$0xff] %v3781_v12  ;;  %v3784_v26 = vmax.f32 %v3676_v14, 0.0  ;;  %v3127_v49 = vpop.f32.mrf.mxu1  ;;  %v3674_v13 = vadd.f32 %v3509_v30, %v3276_v4 }
 0x1e4   : > { %v4623_v59 = vpop.f32.mrf.mxu0  ;;  %v3280_v17 = vadd.f32 %v3127_v49, %v5679_v46 }
 0x1e5   : > { %3820 = vst [vmem:[%s5756_s20 + $0x38] sm:$0xff] %v3784_v26  ;;  %v3782_v3 = vmax.f32 %v3674_v13, 0.0  ;;  %v4589_v27 = vpop.f32.mrf.mxu1  ;;  %v3679_v16 = vadd.f32 %v4623_v59, %v3281_v39 }
 0x1e6   : > { %v3522_v47 = vpop.f32.mrf.mxu0  ;;  %v3285_v24 = vadd.f32 %v4589_v27, %v5682_v6 }
 0x1e7   : > { %3818 = vst [vmem:[%s5756_s20 + $0x28] sm:$0xff] %v3782_v3  ;;  %v3787_v5 = vmax.f32 %v3679_v16, 0.0  ;;  %v3140_v10 = vpop.f32.mrf.mxu1  ;;  %v3677_v40 = vadd.f32 %v3522_v47, %v3279_v50 }
 0x1e8   : > { %v4624_v29 = vpop.f32.mrf.mxu0  ;;  %v3283_v58 = vadd.f32 %v3140_v10, %v5685_v9 }
 0x1e9   : > { %3823 = vst [vmem:[%s5756_s20 + $0x50] sm:$0xff] %v3787_v5  ;;  %v3785_v31 = vmax.f32 %v3677_v40, 0.0  ;;  %v4590_v18 = vpop.f32.mrf.mxu1  ;;  %v3680_v43 = vadd.f32 %v4624_v29, %v3282_v56 }
 0x1ea   : > { %v3525_v62 = vpop.f32.mrf.mxu0  ;;  %v3286_v36 = vadd.f32 %v4590_v18, %v5688_v19 }
 0x1eb   : > { %3821 = vst [vmem:[%s5756_s20 + $0x40] sm:$0xff] %v3785_v31  ;;  %v3788_v22 = vmax.f32 %v3680_v43, 0.0  ;;  %v3143_v20 = vpop.f32.mrf.mxu1  ;;  %v3678_v48 = vadd.f32 %v3525_v62, %v3280_v17 }
 0x1ec   : > { %v4627_v44 = vpop.f32.mrf.mxu0  ;;  %v3284_v35 = vadd.f32 %v3143_v20, %v5691_v23 }
 0x1ed   : > { %3824 = vst [vmem:[%s5756_s20 + $0x58] sm:$0xff] %v3788_v22  ;;  %v3786_v34 = vmax.f32 %v3678_v48, 0.0  ;;  %v4593_v60 = vpop.f32.mrf.mxu1  ;;  %v3683_v46 = vadd.f32 %v4627_v44, %v3285_v24 }
 0x1ee   : > { %v3538_v57 = vpop.f32.mrf.mxu0  ;;  %v3289_v14 = vadd.f32 %v4593_v60, %v5694_v33 }
 0x1ef   : > { %3822 = vst [vmem:[%s5756_s20 + $0x48] sm:$0xff] %v3786_v34  ;;  %v3791_v53 = vmax.f32 %v3683_v46, 0.0  ;;  %v3156_v55 = vpop.f32.mrf.mxu1  ;;  %v3681_v6 = vadd.f32 %v3538_v57, %v3283_v58 }
 0x1f0   : > { %v4628_v2 = vpop.f32.mrf.mxu0  ;;  %v3287_v49 = vadd.f32 %v3156_v55, %v5697_v28 }
 0x1f1   : > { %3827 = vst [vmem:[%s5756_s20 + $0x70] sm:$0xff] %v3791_v53  ;;  %v3789_v4 = vmax.f32 %v3681_v6, 0.0  ;;  %v4594_v12 = vpop.f32.mrf.mxu1  ;;  %v3684_v9 = vadd.f32 %v4628_v2, %v3286_v36 }
 0x1f2   : > { %v3541_v32 = vpop.f32.mrf.mxu0  ;;  %v3290_v3 = vadd.f32 %v4594_v12, %v5700_v41 }
 0x1f3   : > { %3825 = vst [vmem:[%s5756_s20 + $0x60] sm:$0xff] %v3789_v4  ;;  %v3792_v30 = vmax.f32 %v3684_v9, 0.0  ;;  %v3159_v39 = vpop.f32.mrf.mxu1  ;;  %v3682_v19 = vadd.f32 %v3541_v32, %v3284_v35 }
 0x1f4   : > { %v4631_v26 = vpop.f32.mrf.mxu0  ;;  %v3288_v56 = vadd.f32 %v3159_v39, %v5703_v45 }
 0x1f5   : > { %3828 = vst [vmem:[%s5756_s20 + $0x78] sm:$0xff] %v3792_v30  ;;  %v3790_v13 = vmax.f32 %v3682_v19, 0.0  ;;  %v4597_v59 = vpop.f32.mrf.mxu1  ;;  %v3687_v23 = vadd.f32 %v4631_v26, %v3289_v14 }
 0x1f6   : > { %v3554_v50 = vpop.f32.mrf.mxu0  ;;  %v3293_v29 = vadd.f32 %v4597_v59, %v5706_v15 }
 0x1f7   : > { %3826 = vst [vmem:[%s5756_s20 + $0x68] sm:$0xff] %v3790_v13  ;;  %v3795_v27 = vmax.f32 %v3687_v23, 0.0  ;;  %v3172_v16 = vpop.f32.mrf.mxu1  ;;  %v3685_v33 = vadd.f32 %v3554_v50, %v3287_v49 }
 0x1f8   : > { %v4632_v47 = vpop.f32.mrf.mxu0  ;;  %v3291_v43 = vadd.f32 %v3172_v16, %v5709_v21 }
 0x1f9   : > { %3831 = vst [vmem:[%s5756_s20 + $0x90] sm:$0xff] %v3795_v27  ;;  %v3793_v5 = vmax.f32 %v3685_v33, 0.0  ;;  %v4598_v10 = vpop.f32.mrf.mxu1  ;;  %v3688_v28 = vadd.f32 %v4632_v47, %v3290_v3 }
 0x1fa   : > { %v3557_v40 = vpop.f32.mrf.mxu0  ;;  %v3294_v20 = vadd.f32 %v4598_v10, %v5712_v52 }
 0x1fb   : > { %3829 = vst [vmem:[%s5756_s20 + $0x80] sm:$0xff] %v3793_v5  ;;  %v3796_v17 = vmax.f32 %v3688_v28, 0.0  ;;  %v3175_v31 = vpop.f32.mrf.mxu1  ;;  %v3686_v41 = vadd.f32 %v3557_v40, %v3288_v56 }
 0x1fc   : > { %v4635_v18 = vpop.f32.mrf.mxu0  ;;  %v3292_v34 = vadd.f32 %v3175_v31, %v5715_v11 }
 0x1fd   : > { %3832 = vst [vmem:[%s5756_s20 + $0x98] sm:$0xff] %v3796_v17  ;;  %v3794_v62 = vmax.f32 %v3686_v41, 0.0  ;;  %v4601_v24 = vpop.f32.mrf.mxu1  ;;  %v3691_v45 = vadd.f32 %v4635_v18, %v3293_v29 }
 0x1fe   : > { %v3570_v22 = vpop.f32.mrf.mxu0  ;;  %v3297_v36 = vadd.f32 %v4601_v24, %v5718_v38 }
 0x1ff   : > { %3830 = vst [vmem:[%s5756_s20 + $0x88] sm:$0xff] %v3794_v62  ;;  %v3799_v48 = vmax.f32 %v3691_v45, 0.0  ;;  %v3188_v44 = vpop.f32.mrf.mxu1  ;;  %v3689_v15 = vadd.f32 %v3570_v22, %v3291_v43 }
 0x200   : > { %v4636_v58 = vpop.f32.mrf.mxu0  ;;  %v3295_v2 = vadd.f32 %v3188_v44, %v5721_v8 }
 0x201   : > { %3835 = vst [vmem:[%s5756_s20 + $0xb0] sm:$0xff] %v3799_v48  ;;  %v3797_v60 = vmax.f32 %v3689_v15, 0.0  ;;  %v4602_v46 = vpop.f32.mrf.mxu1  ;;  %v3692_v21 = vadd.f32 %v4636_v58, %v3294_v20 }
 0x202   : > { %v3573_v57 = vpop.f32.mrf.mxu0  ;;  %v3298_v9 = vadd.f32 %v4602_v46, %v5724_v42 }
 0x203   : > { %3833 = vst [vmem:[%s5756_s20 + $0xa0] sm:$0xff] %v3797_v60  ;;  %v3800_v53 = vmax.f32 %v3692_v21, 0.0  ;;  %v3191_v55 = vpop.f32.mrf.mxu1  ;;  %v3690_v52 = vadd.f32 %v3573_v57, %v3292_v34 }
 0x204   : > { %v4639_v6 = vpop.f32.mrf.mxu0  ;;  %v3296_v39 = vadd.f32 %v3191_v55, %v5727_v63 }
 0x205   : > { %3836 = vst [vmem:[%s5756_s20 + $0xb8] sm:$0xff] %v3800_v53  ;;  %v3798_v35 = vmax.f32 %v3690_v52, 0.0  ;;  %v4605_v4 = vpop.f32.mrf.mxu1  ;;  %v3695_v11 = vadd.f32 %v4639_v6, %v3297_v36 }
 0x206   : > { %v3586_v12 = vpop.f32.mrf.mxu0  ;;  %v3301_v13 = vadd.f32 %v4605_v4, %v5730_v54 }
 0x207   : > { %3834 = vst [vmem:[%s5756_s20 + $0xa8] sm:$0xff] %v3798_v35  ;;  %v3803_v32 = vmax.f32 %v3695_v11, 0.0  ;;  %v3204_v14 = vpop.f32.mrf.mxu1  ;;  %v3693_v38 = vadd.f32 %v3586_v12, %v3295_v2 }
 0x208   : > { %v4640_v30 = vpop.f32.mrf.mxu0  ;;  %v3299_v3 = vadd.f32 %v3204_v14, %v5733_v1 }
 0x209   : > { %3839 = vst [vmem:[%s5756_s20 + $0xd0] sm:$0xff] %v3803_v32  ;;  %v3801_v19 = vmax.f32 %v3693_v38, 0.0  ;;  %v4606_v26 = vpop.f32.mrf.mxu1  ;;  %v3696_v8 = vadd.f32 %v4640_v30, %v3298_v9 }
 0x20a   : > { %v3589_v49 = vpop.f32.mrf.mxu0  ;;  %v3302_v47 = vadd.f32 %v4606_v26, %v5736_v51 }
 0x20b   : > { %3837 = vst [vmem:[%s5756_s20 + $0xc0] sm:$0xff] %v3801_v19  ;;  %v3804_v59 = vmax.f32 %v3696_v8, 0.0  ;;  %v3207_v23 = vpop.f32.mrf.mxu1  ;;  %v3694_v42 = vadd.f32 %v3589_v49, %v3296_v39 }
 0x20c   : > { %v4643_v50 = vpop.f32.mrf.mxu0  ;;  %v3300_v28 = vadd.f32 %v3207_v23, %v5739_v37 }
 0x20d   : > { %3840 = vst [vmem:[%s5756_s20 + $0xd8] sm:$0xff] %v3804_v59  ;;  %v3802_v27 = vmax.f32 %v3694_v42, 0.0  ;;  %v4609_v16 = vpop.f32.mrf.mxu1  ;;  %v3699_v63 = vadd.f32 %v4643_v50, %v3301_v13 }
 0x20e   : > { %v3602_v33 = vpop.f32.mrf.mxu0  ;;  %v3305_v31 = vadd.f32 %v4609_v16, %v5742_v25 }
 0x20f   : > { %3838 = vst [vmem:[%s5756_s20 + $0xc8] sm:$0xff] %v3802_v27  ;;  %v3807_v56 = vmax.f32 %v3699_v63, 0.0  ;;  %v3220_v54 = vpop.f32.mrf.mxu1  ;;  %v3697_v5 = vadd.f32 %v3602_v33, %v3299_v3 }
 0x210   : > { %v4644_v10 = vpop.f32.mrf.mxu0  ;;  %v3303_v43 = vadd.f32 %v3220_v54, %v5744_v7 }
 0x211   : > { %3843 = vst [vmem:[%s5756_s20 + $0xf0] sm:$0xff] %v3807_v56  ;;  %v3805_v40 = vmax.f32 %v3697_v5, 0.0  ;;  %v3700_v1 = vadd.f32 %v4644_v10, %v3302_v47  ;;  %v4610_v29 = vpop.f32.mrf.mxu1 }
 0x212   : > { %v3605_v17 = vpop.f32.mrf.mxu0  ;;  %v3306_v22 = vadd.f32 %v4610_v29, %v5746_v0 }
 0x213   : > { %3841 = vst [vmem:[%s5756_s20 + $0xe0] sm:$0xff] %v3805_v40  ;;  %v3808_v41 = vmax.f32 %v3700_v1, 0.0  ;;  %v3698_v51 = vadd.f32 %v3605_v17, %v3300_v28  ;;  %v3223_v37 = vpop.f32.mrf.mxu1 }
 0x214   : > { %v4647_v18 = vpop.f32.mrf.mxu0  ;;  %v3304_v44 = vadd.f32 %v3223_v37, %v5750_v61 }
 0x215   : > { %3844 = vst [vmem:[%s5756_s20 + $0xf8] sm:$0xff] %v3808_v41  ;;  %v3806_v62 = vmax.f32 %v3698_v51, 0.0  ;;  %v3703_v24 = vadd.f32 %v4647_v18, %v3305_v31 }
 0x216   : > { %v3618_v45 = vpop.f32.mrf.mxu0 }
 0x217   : > { %3842 = vst [vmem:[%s5756_s20 + $0xe8] sm:$0xff] %v3806_v62  ;;  %v3811_v20 = vmax.f32 %v3703_v24, 0.0  ;;  %v3701_v25 = vadd.f32 %v3618_v45, %v3303_v43 }
 0x218   : > { %v4648_v48 = vpop.f32.mrf.mxu0 }
 0x219   : > { %3847 = vst [vmem:[%s5756_s20 + $0x110] sm:$0xff] %v3811_v20  ;;  %v3809_v15 = vmax.f32 %v3701_v25, 0.0  ;;  %v3704_v58 = vadd.f32 %v4648_v48, %v3306_v22 }
 0x21a   : > { %v3621_v7 = vpop.f32.mrf.mxu0 }
 0x21b   : > { %3845 = vst [vmem:[%s5756_s20 + $0x100] sm:$0xff] %v3809_v15  ;;  %v3812_v34 = vmax.f32 %v3704_v58, 0.0  ;;  %v3702_v60 = vadd.f32 %v3621_v7, %v3304_v44 }
 0x21d   : > { %3848 = vst [vmem:[%s5756_s20 + $0x118] sm:$0xff] %v3812_v34  ;;  %v3810_v46 = vmax.f32 %v3702_v60, 0.0 }
 0x21f   : > { %3846 = vst [vmem:[%s5756_s20 + $0x108] sm:$0xff] %v3810_v46 }
 0x220 PF: > { %s13_s14 = sadd.s32 1, %s4709_s14   ;;  %s5841_s12 = smov %s4705_s13 }
 0x221   : > { %p10_p5 = scmp.ge.s32.totalorder %s13_s14, 4   ;;  %s5842_s13 = smov %s5844_s15 }
 0x223   :  { %12 = sbr.rel (!%p10_p5) target bundleno = 2 (0x2), region = 76 }

</bundles_post_ra>
